<compile_context>
chip_gen: v7x
topology: tpu7x:2x2x1
jax: 0.10.0
libtpu: 0.0.40
codegen_flags: <defaults>
</compile_context>

<pallas_src>
import functools

import jax
import jax.numpy as jnp
from jax import lax
from jax.experimental import pallas as pl
from jax.experimental.pallas import tpu as pltpu

BN_EPS = 1e-5

# Scoped-VMEM budget: above the v5e/v6e defaults (16/32 MiB) so realistic
# tiles fit, but well under v7x's 64 MiB physical VMEM (headroom for
# double-buffering).
_VMEM_LIMIT_BYTES = 40 * 1024 * 1024


def _channel_blocking(c):
    """Split the output-channel axis into 128-lane blocks when possible."""
    if c > 128 and c % 128 == 0:
        return 128, c // 128
    return c, 1


def _cparams(semantics):
    return pltpu.CompilerParams(dimension_semantics=semantics,
                                vmem_limit_bytes=_VMEM_LIMIT_BYTES)


# ---------------------------------------------------------------------------
# Kernels
# ---------------------------------------------------------------------------

def _conv3x3_kernel(*refs, pre_affine, with_proj, relu, H, W):
    """3x3 stride-1 SAME conv on one (1, H, W, Cin) tile.

    Optionally applies a per-channel affine (+ReLU) first (the fused BatchNorm
    of the previous conv), optionally computes the 1x1 projection shortcut
    from the same resident tile, and always emits per-channel (sum, sum_sq)
    partials for the two-pass training-mode BatchNorm of its own output.
    """
    i = 0
    x_ref = refs[i]; i += 1
    w_ref = refs[i]; i += 1                  # (3, 3*Cin, Cblk) bf16
    if pre_affine:
        s_ref = refs[i]; b_ref = refs[i + 1]; i += 2
    if with_proj:
        wsc_ref = refs[i]; i += 1            # (Cin, Cblk) bf16
    y_ref = refs[i]; st_ref = refs[i + 1]; i += 2
    if with_proj:
        sc_ref = refs[i]; stsc_ref = refs[i + 1]

    Cin = x_ref.shape[-1]
    cblk = y_ref.shape[-1]

    x = x_ref[0]                                        # (H, W, Cin) f32
    if pre_affine:
        x = x * s_ref[...].reshape(1, 1, Cin) + b_ref[...].reshape(1, 1, Cin)
        if relu:
            x = jnp.maximum(x, 0.0)

    # Zero-pad H and W by 1 functionally (no scratch buffer, no wrapper pad).
    zcol = jnp.zeros((H, 1, Cin), jnp.float32)
    xw = jnp.concatenate([zcol, x, zcol], axis=1)       # (H, W+2, Cin)
    zrow = jnp.zeros((1, W + 2, Cin), jnp.float32)
    xp = jnp.concatenate([zrow, xw, zrow], axis=0)      # (H+2, W+2, Cin)

    # 3 MXU contractions with K = 3*Cin (dx taps folded into K).
    acc = jnp.zeros((H * W, cblk), jnp.float32)
    for dy in range(3):                                 # static -> unrolled
        rows = xp[dy:dy + H]                            # (H, W+2, Cin)
        patch = jnp.concatenate(
            [rows[:, 0:W, :], rows[:, 1:W + 1, :], rows[:, 2:W + 2, :]],
            axis=-1)                                    # (H, W, 3*Cin)
        pmat = patch.reshape(H * W, 3 * Cin).astype(jnp.bfloat16)
        acc = acc + jnp.dot(pmat, w_ref[dy],
                            preferred_element_type=jnp.float32)

    y_ref[...] = acc.reshape(1, H, W, cblk)
    ssum = jnp.sum(acc, axis=0, keepdims=True)          # (1, cblk)
    ssq = jnp.sum(acc * acc, axis=0, keepdims=True)
    st_ref[...] = jnp.concatenate([ssum, ssq], axis=0)[None]

    if with_proj:
        x2d = x.reshape(H * W, Cin).astype(jnp.bfloat16)
        sc = jnp.dot(x2d, wsc_ref[...], preferred_element_type=jnp.float32)
        sc_ref[...] = sc.reshape(1, H, W, cblk)
        psum = jnp.sum(sc, axis=0, keepdims=True)
        psq = jnp.sum(sc * sc, axis=0, keepdims=True)
        stsc_ref[...] = jnp.concatenate([psum, psq], axis=0)[None]


def _combine_kernel(*refs, has_proj, pre_shortcut):
    """Residual combine: bn2 affine on conv2 output + shortcut add.

    Shortcut variants:
      - projection:   raw 1x1-conv output + its fused BN affine,
      - identity with a pending (lazy) affine+ReLU (stem -> blk1 fusion),
      - plain identity.
    """
    if has_proj:
        y2_ref, s2_ref, b2_ref, sc_ref, ssc_ref, bsc_ref, o_ref = refs
    elif pre_shortcut:
        y2_ref, s2_ref, b2_ref, sc_ref, ps_ref, pb_ref, o_ref = refs
    else:
        y2_ref, s2_ref, b2_ref, sc_ref, o_ref = refs
    c = y2_ref.shape[-1]

    def vec(r):
        return r[...].reshape(1, 1, 1, c)

    out = y2_ref[...] * vec(s2_ref) + vec(b2_ref)
    if has_proj:
        out = out + sc_ref[...] * vec(ssc_ref) + vec(bsc_ref)
    elif pre_shortcut:
        out = out + jnp.maximum(sc_ref[...] * vec(ps_ref) + vec(pb_ref), 0.0)
    else:
        out = out + sc_ref[...]
    o_ref[...] = out


def _linear_kernel(x_ref, w_ref, b_ref, o_ref, acc_ref):
    k = pl.program_id(0)

    @pl.when(k == 0)
    def _():
        acc_ref[...] = jnp.zeros_like(acc_ref)

    acc_ref[...] += jnp.dot(x_ref[...].astype(jnp.bfloat16), w_ref[...],
                            preferred_element_type=jnp.float32)

    @pl.when(k == pl.num_programs(0) - 1)
    def _():
        o_ref[...] = acc_ref[...] + b_ref[...]


# ---------------------------------------------------------------------------
# Wrappers (grid / BlockSpec plumbing)
# ---------------------------------------------------------------------------

def _conv3x3_stats(x, w, *, pre_scale=None, pre_shift=None, relu=False, wproj=None):
    """Raw 3x3 conv + per-channel BN statistics, grid over (batch, C-blocks)."""
    N, H, W, Cin = x.shape
    Cout = w.shape[-1]
    cblk, cbn = _channel_blocking(Cout)
    pre_affine = pre_scale is not None
    with_proj = wproj is not None

    wr = w.reshape(3, 3 * Cin, Cout).astype(jnp.bfloat16)

    x_spec = pl.BlockSpec((1, H, W, Cin), lambda n, c: (n, 0, 0, 0))
    w_spec = pl.BlockSpec((3, 3 * Cin, cblk), lambda n, c: (0, 0, c))
    invec_spec = pl.BlockSpec((1, Cin), lambda n, c: (0, 0))
    y_spec = pl.BlockSpec((1, H, W, cblk), lambda n, c: (n, 0, 0, c))
    st_spec = pl.BlockSpec((1, 2, cblk), lambda n, c: (n, 0, c))

    inputs = [x, wr]
    in_specs = [x_spec, w_spec]
    if pre_affine:
        inputs += [pre_scale, pre_shift]
        in_specs += [invec_spec, invec_spec]
    if with_proj:
        wscr = wproj.astype(jnp.bfloat16)
        inputs += [wscr]
        in_specs += [pl.BlockSpec((Cin, cblk), lambda n, c: (0, c))]

    out_shape = [jax.ShapeDtypeStruct((N, H, W, Cout), jnp.float32),
                 jax.ShapeDtypeStruct((N, 2, Cout), jnp.float32)]
    out_specs = [y_spec, st_spec]
    if with_proj:
        out_shape += [jax.ShapeDtypeStruct((N, H, W, Cout), jnp.float32),
                      jax.ShapeDtypeStruct((N, 2, Cout), jnp.float32)]
        out_specs += [y_spec, st_spec]

    flops = 2 * N * H * W * 9 * Cin * Cout
    out_elems = N * H * W * Cout + N * 2 * Cout
    bytes_accessed = int(x.size) * 4 + int(wr.size) * 2 + out_elems * 4
    if with_proj:
        flops += 2 * N * H * W * Cin * Cout
        bytes_accessed += int(wproj.size) * 2 + out_elems * 4

    return pl.pallas_call(
        functools.partial(_conv3x3_kernel, pre_affine=pre_affine,
                          with_proj=with_proj, relu=relu, H=H, W=W),
        grid=(N, cbn),
        in_specs=in_specs,
        out_specs=tuple(out_specs),
        out_shape=tuple(out_shape),
        compiler_params=_cparams(("parallel", "parallel")),
        cost_estimate=pl.CostEstimate(flops=flops, transcendentals=0,
                                      bytes_accessed=bytes_accessed),
    )(*inputs)


def _bn_affine_from_stats(stats, gamma, beta, count):
    """Finalise training-mode BatchNorm from per-tile (sum, sum_sq) partials."""
    ssum = jnp.sum(stats[:, 0, :], axis=0)
    ssq = jnp.sum(stats[:, 1, :], axis=0)
    mean = ssum / count
    var = jnp.maximum(ssq / count - mean * mean, 0.0)
    scale = gamma * lax.rsqrt(var + BN_EPS)
    shift = beta - mean * scale
    return scale[None, :], shift[None, :]               # (1, C) each


def _combine(y2, s2, b2, shortcut, ssc=None, bsc=None, pre=None):
    N, H, W, C = y2.shape
    cblk, cbn = _channel_blocking(C)
    has_proj = ssc is not None
    pre_shortcut = (pre is not None) and not has_proj
    t_spec = pl.BlockSpec((1, H, W, cblk), lambda n, c: (n, 0, 0, c))
    v_spec = pl.BlockSpec((1, cblk), lambda n, c: (0, c))
    inputs = [y2, s2, b2, shortcut]
    in_specs = [t_spec, v_spec, v_spec, t_spec]
    if has_proj:
        inputs += [ssc, bsc]
        in_specs += [v_spec, v_spec]
    elif pre_shortcut:
        inputs += [pre[0], pre[1]]
        in_specs += [v_spec, v_spec]
    return pl.pallas_call(
        functools.partial(_combine_kernel, has_proj=has_proj,
                          pre_shortcut=pre_shortcut),
        grid=(N, cbn),
        in_specs=in_specs,
        out_specs=t_spec,
        out_shape=jax.ShapeDtypeStruct((N, H, W, C), jnp.float32),
        compiler_params=_cparams(("parallel", "parallel")),
    )(*inputs)


def _linear(x_flat, w, b):
    N, F = x_flat.shape
    O = w.shape[-1]
    nk = 1
    for cand in (8, 4, 2):
        if F % cand == 0 and (F // cand) % 128 == 0:
            nk = cand
            break
    FK = F // nk
    return pl.pallas_call(
        _linear_kernel,
        grid=(nk,),
        in_specs=[pl.BlockSpec((N, FK), lambda k: (0, k)),
                  pl.BlockSpec((FK, O), lambda k: (k, 0)),
                  pl.BlockSpec((1, O), lambda k: (0, 0))],
        out_specs=pl.BlockSpec((N, O), lambda k: (0, 0)),
        out_shape=jax.ShapeDtypeStruct((N, O), jnp.float32),
        scratch_shapes=[pltpu.VMEM((N, O), jnp.float32)],
        compiler_params=_cparams(("arbitrary",)),
    )(x_flat, w.astype(jnp.bfloat16), b.reshape(1, O))


# ---------------------------------------------------------------------------
# Model forward (Pallas) and pure-JAX reference
# ---------------------------------------------------------------------------

def resblk_forward(x, p, pre=None):
    """One ResBlk on an NHWC f32 activation (training-mode BatchNorm).

    `pre` = (scale, shift) of a pending BN affine (+ReLU) on `x` (used to fuse
    the stem's BN+ReLU into blk1); if given, `x` is the raw conv output and
    the affine is applied lazily inside the conv1 / combine kernels.
    """
    N, H, W, Cin = x.shape
    Cout = p["w1"].shape[-1]
    has_proj = Cin != Cout
    count = N * H * W
    pre_s, pre_b = pre if pre is not None else (None, None)

    if has_proj:
        y1, st1, sc_raw, stsc = _conv3x3_stats(
            x, p["w1"], pre_scale=pre_s, pre_shift=pre_b,
            relu=pre is not None, wproj=p["wsc"])
    else:
        y1, st1 = _conv3x3_stats(x, p["w1"], pre_scale=pre_s,
                                 pre_shift=pre_b, relu=pre is not None)
    s1, b1 = _bn_affine_from_stats(st1, p["g1"], p["be1"], count)

    # bn1 + ReLU are fused into conv2's kernel as a pre-affine.
    y2, st2 = _conv3x3_stats(y1, p["w2"], pre_scale=s1, pre_shift=b1, relu=True)
    s2, b2 = _bn_affine_from_stats(st2, p["g2"], p["be2"], count)

    if has_proj:
        ssc, bsc = _bn_affine_from_stats(stsc, p["gsc"], p["besc"], count)
        return _combine(y2, s2, b2, sc_raw, ssc=ssc, bsc=bsc)
    return _combine(y2, s2, b2, x, pre=pre)


def resnet18_forward(x_nchw, params):
    """Full ResNet18 forward: NCHW input -> (N, 10) logits."""
    x = jnp.transpose(x_nchw, (0, 2, 3, 1)).astype(jnp.float32)
    N, H, W, _ = x.shape
    st = params["stem"]

    # Stem conv + stats; its BN+ReLU are fused lazily into blk1 (no extra
    # elementwise pass over the stem activation).
    y0, st0 = _conv3x3_stats(x, st["w"])
    s0, b0 = _bn_affine_from_stats(st0, st["g"], st["be"], N * H * W)

    x = resblk_forward(y0, params["blk1"], pre=(s0, b0))
    x = resblk_forward(x, params["blk2"])
    x = resblk_forward(x, params["blk3"])
    x = resblk_forward(x, params["blk4"])
    n = x.shape[0]
    x_flat = jnp.transpose(x, (0, 3, 1, 2)).reshape(n, -1)   # PyTorch .view order
    return _linear(x_flat, params["fc_w"], params["fc_b"])


def _conv3x3_ref(x, w):
    # Mirrors the kernel's precision policy: bf16 operands, f32 accumulation.
    return lax.conv_general_dilated(
        x.astype(jnp.bfloat16), w.astype(jnp.bfloat16), (1, 1), "SAME",
        dimension_numbers=("NHWC", "HWIO", "NHWC"),
        preferred_element_type=jnp.float32)


def _bn_ref(y, g, be):
    m = jnp.mean(y, axis=(0, 1, 2), keepdims=True)
    v = jnp.mean((y - m) ** 2, axis=(0, 1, 2), keepdims=True)
    return (y - m) * lax.rsqrt(v + BN_EPS) * g + be


def resblk_ref(x, p):
    h = jax.nn.relu(_bn_ref(_conv3x3_ref(x, p["w1"]), p["g1"], p["be1"]))
    o = _bn_ref(_conv3x3_ref(h, p["w2"]), p["g2"], p["be2"])
    if x.shape[-1] != p["w1"].shape[-1]:
        sc = jnp.einsum("nhwc,cd->nhwd", x.astype(jnp.bfloat16),
                        p["wsc"].astype(jnp.bfloat16),
                        preferred_element_type=jnp.float32)
        sc = _bn_ref(sc, p["gsc"], p["besc"])
    else:
        sc = x
    return sc + o


def resnet18_ref(x_nchw, params):
    x = jnp.transpose(x_nchw, (0, 2, 3, 1)).astype(jnp.float32)
    st = params["stem"]
    x = jax.nn.relu(_bn_ref(_conv3x3_ref(x, st["w"]), st["g"], st["be"]))
    for name in ("blk1", "blk2", "blk3", "blk4"):
        x = resblk_ref(x, params[name])
    n = x.shape[0]
    x_flat = jnp.transpose(x, (0, 3, 1, 2)).reshape(n, -1)
    return (jnp.dot(x_flat.astype(jnp.bfloat16),
                    params["fc_w"].astype(jnp.bfloat16),
                    preferred_element_type=jnp.float32) + params["fc_b"])


# ---------------------------------------------------------------------------
# Synthetic parameters (conv weights in HWIO; conv biases omitted because
# training-mode BatchNorm cancels them exactly - same forward output).
# ---------------------------------------------------------------------------

def init_resblk_params(key, cin, cout):
    ks = jax.random.split(key, 9)

    def conv_w(k, ci, co):
        return jax.random.normal(k, (3, 3, ci, co), jnp.float32) * (2.0 / (9 * ci)) ** 0.5

    p = {"w1": conv_w(ks[0], cin, cout),
         "g1": 1.0 + 0.1 * jax.random.normal(ks[1], (cout,), jnp.float32),
         "be1": 0.05 * jax.random.normal(ks[2], (cout,), jnp.float32),
         "w2": conv_w(ks[3], cout, cout),
         "g2": 1.0 + 0.1 * jax.random.normal(ks[4], (cout,), jnp.float32),
         "be2": 0.05 * jax.random.normal(ks[5], (cout,), jnp.float32)}
    if cin != cout:
        p["wsc"] = jax.random.normal(ks[6], (cin, cout), jnp.float32) * (1.0 / cin) ** 0.5
        p["gsc"] = 1.0 + 0.1 * jax.random.normal(ks[7], (cout,), jnp.float32)
        p["besc"] = 0.05 * jax.random.normal(ks[8], (cout,), jnp.float32)
    return p


def init_resnet18_params(key, widths, H, W):
    c0, c1, c2, c3, c4 = widths
    ks = jax.random.split(key, 9)
    stem = {"w": jax.random.normal(ks[0], (3, 3, 3, c0), jnp.float32) * (2.0 / 27.0) ** 0.5,
            "g": 1.0 + 0.1 * jax.random.normal(ks[1], (c0,), jnp.float32),
            "be": 0.05 * jax.random.normal(ks[2], (c0,), jnp.float32)}
    return {"stem": stem,
            "blk1": init_resblk_params(ks[3], c0, c1),
            "blk2": init_resblk_params(ks[4], c1, c2),
            "blk3": init_resblk_params(ks[5], c2, c3),
            "blk4": init_resblk_params(ks[6], c3, c4),
            "fc_w": 0.01 * jax.random.normal(ks[7], (c4 * H * W, 10), jnp.float32),
            "fc_b": 0.01 * jax.random.normal(ks[8], (10,), jnp.float32)}


if __name__ == "__main__":
    key = jax.random.PRNGKey(0)
    k_x, k_p, k_bx, k_bp = jax.random.split(key, 4)

    N, H, W = 2, 16, 16

    # ---- standalone ResBlk check (projection-shortcut path) -----------------
    cin_b, cout_b = 8, 16
    xb_nchw = jax.random.normal(k_bx, (N, cin_b, H, W), jnp.float32)
    pb = init_resblk_params(k_bp, cin_b, cout_b)
    xb = jnp.transpose(xb_nchw, (0, 2, 3, 1))
    blk_out = jax.block_until_ready(resblk_forward(xb, pb))
    blk_ref = jax.block_until_ready(resblk_ref(xb, pb))
    assert blk_out.shape == (N, H, W, cout_b)
    assert jnp.allclose(blk_out, blk_ref, atol=5e-3, rtol=5e-3), "ResBlk mismatch"

    # ---- full ResNet18 forward (scaled-down widths, structure preserved) ----
    widths = (8, 8, 16, 32, 64)      # stem, blk1..blk4 (real model uses 64..512)
    x = jax.random.normal(k_x, (N, 3, H, W), jnp.float32)    # NCHW, 3 channels
    params = init_resnet18_params(k_p, widths, H, W)

    logits = jax.block_until_ready(resnet18_forward(x, params))
    assert logits.shape == (N, 10)
    ref = jax.block_until_ready(resnet18_ref(x, params))
    assert jnp.allclose(logits, ref, atol=1e-2, rtol=1e-2), "ResNet18 mismatch"

    print("KERNEL_OK")
</pallas_src>

<mosaic_0001>
module attributes {stable_mosaic.version = 11 : i64} {
  func.func @_conv3x3_kernel(%arg0: i32, %arg1: i32, %arg2: memref<1x16x16x8xf32, #tpu.memory_space<vmem>>, %arg3: memref<3x24x16xbf16, #tpu.memory_space<vmem>>, %arg4: memref<8x16xbf16, #tpu.memory_space<vmem>>, %arg5: memref<1x16x16x16xf32, #tpu.memory_space<vmem>>, %arg6: memref<1x2x16xf32, #tpu.memory_space<vmem>>, %arg7: memref<1x16x16x16xf32, #tpu.memory_space<vmem>>, %arg8: memref<1x2x16xf32, #tpu.memory_space<vmem>>) attributes {dimension_semantics = [#tpu.dimension_semantics<parallel>, #tpu.dimension_semantics<parallel>], iteration_bounds = array<i64: 2, 1>, scalar_prefetch = 0 : i64, scratch_operands = 0 : i64, tpu.core_type = #tpu.core_type<tc>, window_params = [{transform_indices = @transform_0, window_bounds = array<i64: 1, 16, 16, 8>}, {transform_indices = @transform_1, window_bounds = array<i64: 3, 24, 16>}, {transform_indices = @transform_2, window_bounds = array<i64: 8, 16>}, {transform_indices = @transform_3, window_bounds = array<i64: 1, 16, 16, 16>}, {transform_indices = @transform_4, window_bounds = array<i64: 1, 2, 16>}, {transform_indices = @transform_5, window_bounds = array<i64: 1, 16, 16, 16>}, {transform_indices = @transform_6, window_bounds = array<i64: 1, 2, 16>}]} {
    %c0 = arith.constant 0 : index
    %c0_0 = arith.constant 0 : index
    %c0_1 = arith.constant 0 : index
    %c0_2 = arith.constant 0 : index
    %0 = vector.load %arg2[%c0, %c0_0, %c0_1, %c0_2] : memref<1x16x16x8xf32, #tpu.memory_space<vmem>>, vector<1x16x16x8xf32>
    %1 = vector.shape_cast %0 : vector<1x16x16x8xf32> to vector<16x16x8xf32>
    %cst = arith.constant 0.000000e+00 : f32
    %2 = vector.broadcast %cst : f32 to vector<16x1x8xf32>
    %3 = tpu.concatenate %2, %1, %2 in 1 : vector<16x1x8xf32>, vector<16x16x8xf32>, vector<16x1x8xf32> -> vector<16x18x8xf32>
    %cst_3 = arith.constant 0.000000e+00 : f32
    %4 = vector.broadcast %cst_3 : f32 to vector<1x18x8xf32>
    %5 = tpu.concatenate %4, %3, %4 in 0 : vector<1x18x8xf32>, vector<16x18x8xf32>, vector<1x18x8xf32> -> vector<18x18x8xf32>
    %cst_4 = arith.constant 0.000000e+00 : f32
    %6 = vector.broadcast %cst_4 : f32 to vector<256x16xf32>
    %7 = vector.extract_strided_slice %5 {offsets = [0, 0, 0], sizes = [16, 18, 8], strides = [1, 1, 1]} : vector<18x18x8xf32> to vector<16x18x8xf32>
    %8 = vector.extract_strided_slice %7 {offsets = [0, 0, 0], sizes = [16, 16, 8], strides = [1, 1, 1]} : vector<16x18x8xf32> to vector<16x16x8xf32>
    %9 = vector.extract_strided_slice %7 {offsets = [0, 1, 0], sizes = [16, 16, 8], strides = [1, 1, 1]} : vector<16x18x8xf32> to vector<16x16x8xf32>
    %10 = vector.extract_strided_slice %7 {offsets = [0, 2, 0], sizes = [16, 16, 8], strides = [1, 1, 1]} : vector<16x18x8xf32> to vector<16x16x8xf32>
    %11 = tpu.concatenate %8, %9, %10 in 2 : vector<16x16x8xf32>, vector<16x16x8xf32>, vector<16x16x8xf32> -> vector<16x16x24xf32>
    %12 = vector.shape_cast %11 : vector<16x16x24xf32> to vector<256x24xf32>
    %13 = arith.truncf %12 : vector<256x24xf32> to vector<256x24xbf16>
    %c0_5 = arith.constant 0 : index
    %c0_6 = arith.constant 0 : index
    %c0_7 = arith.constant 0 : index
    %14 = vector.load %arg3[%c0_5, %c0_6, %c0_7] : memref<3x24x16xbf16, #tpu.memory_space<vmem>>, vector<1x24x16xbf16>
    %15 = vector.shape_cast %14 : vector<1x24x16xbf16> to vector<24x16xbf16>
    %cst_8 = arith.constant dense<0.000000e+00> : vector<256x16xf32>
    %16 = tpu.matmul %13, %15, %cst_8 {dimension_numbers = #tpu.dot_dimension_numbers<[1], [0], [0], [1], [0, 0, 1, 1], [], []>} : vector<256x24xbf16>, vector<24x16xbf16>, vector<256x16xf32> -> vector<256x16xf32>
    %17 = arith.addf %6, %16 : vector<256x16xf32>
    %18 = vector.extract_strided_slice %5 {offsets = [1, 0, 0], sizes = [16, 18, 8], strides = [1, 1, 1]} : vector<18x18x8xf32> to vector<16x18x8xf32>
    %19 = vector.extract_strided_slice %18 {offsets = [0, 0, 0], sizes = [16, 16, 8], strides = [1, 1, 1]} : vector<16x18x8xf32> to vector<16x16x8xf32>
    %20 = vector.extract_strided_slice %18 {offsets = [0, 1, 0], sizes = [16, 16, 8], strides = [1, 1, 1]} : vector<16x18x8xf32> to vector<16x16x8xf32>
    %21 = vector.extract_strided_slice %18 {offsets = [0, 2, 0], sizes = [16, 16, 8], strides = [1, 1, 1]} : vector<16x18x8xf32> to vector<16x16x8xf32>
    %22 = tpu.concatenate %19, %20, %21 in 2 : vector<16x16x8xf32>, vector<16x16x8xf32>, vector<16x16x8xf32> -> vector<16x16x24xf32>
    %23 = vector.shape_cast %22 : vector<16x16x24xf32> to vector<256x24xf32>
    %24 = arith.truncf %23 : vector<256x24xf32> to vector<256x24xbf16>
    %c1 = arith.constant 1 : index
    %c0_9 = arith.constant 0 : index
    %c0_10 = arith.constant 0 : index
    %25 = vector.load %arg3[%c1, %c0_9, %c0_10] : memref<3x24x16xbf16, #tpu.memory_space<vmem>>, vector<1x24x16xbf16>
    %26 = vector.shape_cast %25 : vector<1x24x16xbf16> to vector<24x16xbf16>
    %cst_11 = arith.constant dense<0.000000e+00> : vector<256x16xf32>
    %27 = tpu.matmul %24, %26, %cst_11 {dimension_numbers = #tpu.dot_dimension_numbers<[1], [0], [0], [1], [0, 0, 1, 1], [], []>} : vector<256x24xbf16>, vector<24x16xbf16>, vector<256x16xf32> -> vector<256x16xf32>
    %28 = arith.addf %17, %27 : vector<256x16xf32>
    %29 = vector.extract_strided_slice %5 {offsets = [2, 0, 0], sizes = [16, 18, 8], strides = [1, 1, 1]} : vector<18x18x8xf32> to vector<16x18x8xf32>
    %30 = vector.extract_strided_slice %29 {offsets = [0, 0, 0], sizes = [16, 16, 8], strides = [1, 1, 1]} : vector<16x18x8xf32> to vector<16x16x8xf32>
    %31 = vector.extract_strided_slice %29 {offsets = [0, 1, 0], sizes = [16, 16, 8], strides = [1, 1, 1]} : vector<16x18x8xf32> to vector<16x16x8xf32>
    %32 = vector.extract_strided_slice %29 {offsets = [0, 2, 0], sizes = [16, 16, 8], strides = [1, 1, 1]} : vector<16x18x8xf32> to vector<16x16x8xf32>
    %33 = tpu.concatenate %30, %31, %32 in 2 : vector<16x16x8xf32>, vector<16x16x8xf32>, vector<16x16x8xf32> -> vector<16x16x24xf32>
    %34 = vector.shape_cast %33 : vector<16x16x24xf32> to vector<256x24xf32>
    %35 = arith.truncf %34 : vector<256x24xf32> to vector<256x24xbf16>
    %c2 = arith.constant 2 : index
    %c0_12 = arith.constant 0 : index
    %c0_13 = arith.constant 0 : index
    %36 = vector.load %arg3[%c2, %c0_12, %c0_13] : memref<3x24x16xbf16, #tpu.memory_space<vmem>>, vector<1x24x16xbf16>
    %37 = vector.shape_cast %36 : vector<1x24x16xbf16> to vector<24x16xbf16>
    %cst_14 = arith.constant dense<0.000000e+00> : vector<256x16xf32>
    %38 = tpu.matmul %35, %37, %cst_14 {dimension_numbers = #tpu.dot_dimension_numbers<[1], [0], [0], [1], [0, 0, 1, 1], [], []>} : vector<256x24xbf16>, vector<24x16xbf16>, vector<256x16xf32> -> vector<256x16xf32>
    %39 = arith.addf %28, %38 : vector<256x16xf32>
    %40 = vector.shape_cast %39 : vector<256x16xf32> to vector<1x16x16x16xf32>
    %c0_15 = arith.constant 0 : index
    %c0_16 = arith.constant 0 : index
    %c0_17 = arith.constant 0 : index
    %c0_18 = arith.constant 0 : index
    %41 = vector.load %arg5[%c0_15, %c0_16, %c0_17, %c0_18] : memref<1x16x16x16xf32, #tpu.memory_space<vmem>>, vector<1x16x16x16xf32>
    tpu.vector_store %arg5[%c0_15, %c0_16, %c0_17, %c0_18], %40 {strides = array<i32>} : memref<1x16x16x16xf32, #tpu.memory_space<vmem>>, vector<1x16x16x16xf32>,
    %cst_19 = arith.constant dense<0.000000e+00> : vector<16xf32>
    %42 = vector.multi_reduction <add>, %39, %cst_19 [0] : vector<256x16xf32> to vector<16xf32>
    %43 = vector.shape_cast %42 : vector<16xf32> to vector<1x16xf32>
    %44 = arith.mulf %39, %39 : vector<256x16xf32>
    %cst_20 = arith.constant dense<0.000000e+00> : vector<16xf32>
    %45 = vector.multi_reduction <add>, %44, %cst_20 [0] : vector<256x16xf32> to vector<16xf32>
    %46 = vector.shape_cast %45 : vector<16xf32> to vector<1x16xf32>
    %47 = tpu.concatenate %43, %46 in 0 : vector<1x16xf32>, vector<1x16xf32> -> vector<2x16xf32>
    %48 = vector.shape_cast %47 : vector<2x16xf32> to vector<1x2x16xf32>
    %c0_21 = arith.constant 0 : index
    %c0_22 = arith.constant 0 : index
    %c0_23 = arith.constant 0 : index
    %49 = vector.load %arg6[%c0_21, %c0_22, %c0_23] : memref<1x2x16xf32, #tpu.memory_space<vmem>>, vector<1x2x16xf32>
    tpu.vector_store %arg6[%c0_21, %c0_22, %c0_23], %48 {strides = array<i32>} : memref<1x2x16xf32, #tpu.memory_space<vmem>>, vector<1x2x16xf32>,
    %50 = vector.shape_cast %1 : vector<16x16x8xf32> to vector<256x8xf32>
    %51 = arith.truncf %50 : vector<256x8xf32> to vector<256x8xbf16>
    %c0_24 = arith.constant 0 : index
    %c0_25 = arith.constant 0 : index
    %52 = vector.load %arg4[%c0_24, %c0_25] : memref<8x16xbf16, #tpu.memory_space<vmem>>, vector<8x16xbf16>
    %cst_26 = arith.constant dense<0.000000e+00> : vector<256x16xf32>
    %53 = tpu.matmul %51, %52, %cst_26 {dimension_numbers = #tpu.dot_dimension_numbers<[1], [0], [0], [1], [0, 0, 1, 1], [], []>} : vector<256x8xbf16>, vector<8x16xbf16>, vector<256x16xf32> -> vector<256x16xf32>
    %54 = vector.shape_cast %53 : vector<256x16xf32> to vector<1x16x16x16xf32>
    %c0_27 = arith.constant 0 : index
    %c0_28 = arith.constant 0 : index
    %c0_29 = arith.constant 0 : index
    %c0_30 = arith.constant 0 : index
    %55 = vector.load %arg7[%c0_27, %c0_28, %c0_29, %c0_30] : memref<1x16x16x16xf32, #tpu.memory_space<vmem>>, vector<1x16x16x16xf32>
    tpu.vector_store %arg7[%c0_27, %c0_28, %c0_29, %c0_30], %54 {strides = array<i32>} : memref<1x16x16x16xf32, #tpu.memory_space<vmem>>, vector<1x16x16x16xf32>,
    %cst_31 = arith.constant dense<0.000000e+00> : vector<16xf32>
    %56 = vector.multi_reduction <add>, %53, %cst_31 [0] : vector<256x16xf32> to vector<16xf32>
    %57 = vector.shape_cast %56 : vector<16xf32> to vector<1x16xf32>
    %58 = arith.mulf %53, %53 : vector<256x16xf32>
    %cst_32 = arith.constant dense<0.000000e+00> : vector<16xf32>
    %59 = vector.multi_reduction <add>, %58, %cst_32 [0] : vector<256x16xf32> to vector<16xf32>
    %60 = vector.shape_cast %59 : vector<16xf32> to vector<1x16xf32>
    %61 = tpu.concatenate %57, %60 in 0 : vector<1x16xf32>, vector<1x16xf32> -> vector<2x16xf32>
    %62 = vector.shape_cast %61 : vector<2x16xf32> to vector<1x2x16xf32>
    %c0_33 = arith.constant 0 : index
    %c0_34 = arith.constant 0 : index
    %c0_35 = arith.constant 0 : index
    %63 = vector.load %arg8[%c0_33, %c0_34, %c0_35] : memref<1x2x16xf32, #tpu.memory_space<vmem>>, vector<1x2x16xf32>
    tpu.vector_store %arg8[%c0_33, %c0_34, %c0_35], %62 {strides = array<i32>} : memref<1x2x16xf32, #tpu.memory_space<vmem>>, vector<1x2x16xf32>,
    return
  }
  func.func @transform_0(%arg0: i32, %arg1: i32) -> (i32, i32, i32, i32) {
    %c0_i32 = arith.constant 0 : i32
    %c0_i32_0 = arith.constant 0 : i32
    %c0_i32_1 = arith.constant 0 : i32
    %c0_i32_2 = arith.constant 0 : i32
    return %arg0, %c0_i32, %c0_i32_0, %c0_i32_1 : i32, i32, i32, i32
  }
  func.func @transform_1(%arg0: i32, %arg1: i32) -> (i32, i32, i32) {
    %c0_i32 = arith.constant 0 : i32
    %c0_i32_0 = arith.constant 0 : i32
    %c0_i32_1 = arith.constant 0 : i32
    return %c0_i32, %c0_i32_0, %arg1 : i32, i32, i32
  }
  func.func @transform_2(%arg0: i32, %arg1: i32) -> (i32, i32) {
    %c0_i32 = arith.constant 0 : i32
    %c0_i32_0 = arith.constant 0 : i32
    return %c0_i32, %arg1 : i32, i32
  }
  func.func @transform_3(%arg0: i32, %arg1: i32) -> (i32, i32, i32, i32) {
    %c0_i32 = arith.constant 0 : i32
    %c0_i32_0 = arith.constant 0 : i32
    %c0_i32_1 = arith.constant 0 : i32
    return %arg0, %c0_i32, %c0_i32_0, %arg1 : i32, i32, i32, i32
  }
  func.func @transform_4(%arg0: i32, %arg1: i32) -> (i32, i32, i32) {
    %c0_i32 = arith.constant 0 : i32
    %c0_i32_0 = arith.constant 0 : i32
    return %arg0, %c0_i32, %arg1 : i32, i32, i32
  }
  func.func @transform_5(%arg0: i32, %arg1: i32) -> (i32, i32, i32, i32) {
    %c0_i32 = arith.constant 0 : i32
    %c0_i32_0 = arith.constant 0 : i32
    %c0_i32_1 = arith.constant 0 : i32
    return %arg0, %c0_i32, %c0_i32_0, %arg1 : i32, i32, i32, i32
  }
  func.func @transform_6(%arg0: i32, %arg1: i32) -> (i32, i32, i32) {
    %c0_i32 = arith.constant 0 : i32
    %c0_i32_0 = arith.constant 0 : i32
    return %arg0, %c0_i32, %arg1 : i32, i32, i32
  }
}

</mosaic_0001>

<bundles_post_ra>
// kernel: tpu_custom_call.1
= control target key start
LH: loop header
LB: loop body
LE: loop exit
PB: predicated region body
PF: predicated region fallthrough
CT: control target
= control target key end

     0   :  { %s4825_s0 = inlined_call_operand.vmem [shape: f32[2,16,16,8], index: 0, kind: input, shape index: {}]   ;;  %s4826_s1 = inlined_call_operand.vmem [shape: bf16[3,24,16], index: 1, kind: input, shape index: {}]   ;;  %s4827_s2 = inlined_call_operand.vmem [shape: bf16[8,16], index: 2, kind: input, shape index: {}]   ;;  %s4828_s3 = inlined_call_operand.hbm [shape: f32[2,16,16,16], index: 3, kind: output, shape index: {0}]   ;;  %s4829_s4 = inlined_call_operand.hbm [shape: f32[2,2,16], index: 4, kind: output, shape index: {1}]   ;;  %s4830_s5 = inlined_call_operand.hbm [shape: f32[2,16,16,16], index: 5, kind: output, shape index: {2}]   ;;  %s4831_s6 = inlined_call_operand.hbm [shape: f32[2,2,16], index: 6, kind: output, shape index: {3}]  }
   0x1   :  { %4849 = sst [smem:[#allocation24_spill]] %s4825_s0 }
   0x2   :  { %4850 = sst [smem:[#allocation25_spill]] %s4826_s1 }
   0x3   :  { %4851 = sst [smem:[#allocation26_spill]] %s4827_s2 }
   0x4   :  { %12 = vsyncpa [#allocation3], 0 }
   0x5   :  { %14 = vsyncpa [#allocation3 + $0x1], 0 }
   0x6   :  { %15 = vsyncpa [#allocation5], 0 }
   0x7   :  { %17 = vsyncpa [#allocation5 + $0x1], 0 }
   0x8   :  { %18 = vsyncpa [#allocation8], 0 }
   0x9   :  { %20 = vsyncpa [#allocation8 + $0x1], 0  ;;  %s3383_s21 = smov 0   ;;  %s3385_s22 = smov 0  }
   0xa   :  { %s3387_s23 = smov 0   ;;  %s3389_s24 = smov 0  }
   0xb   :  { %s3391_s25 = smov 0   ;;  %s3393_s26 = smov 0  }
   0xc LB: > { %s4846_s27 = sadd.s32 4294967295, %s3338_s26   ;;  %s4844_s28 = sadd.s32 4294967294, %s3338_s26   ;;  %s3338_s26 = sphi %s3393_s26, %s26_s26   ;;  %s3334_s25 = sphi %s3391_s25, %s4891_s25   ;;  %s3330_s24 = sphi %s3389_s24, %s4890_s24   ;;  %s3326_s23 = sphi %s3387_s23, %s4889_s23   ;;  %s3322_s22 = sphi %s3385_s22, %s4888_s22   ;;  %s3318_s21 = sphi %s3383_s21, %s4887_s21  }
   0xd   : > { %s38_s29 = sadd.s32 1, %s3334_s25  ;;  %s125_s30 = sadd.s32 1, %s3326_s23 }
   0xe   : > { %p40_p0 = scmp.ge.s32.totalorder %s38_s29, 2  ;;  %p135_p1 = scmp.ne.s32.totalorder %s3326_s23, %s3322_s22 }
   0xf   : > { %p136_p2 = scmp.eq.s32.totalorder %s4846_s27, 1  ;;  %p141_p3 = scmp.ne.s32.totalorder %s3322_s22, %s3318_s21 }
  0x10   : > { %s4893_s29 = smov (%p40_p0, %s38_s29), 0  ;;  %p142_p5 = scmp.eq.s32.totalorder %s4844_s28, 1 }
  0x11   : > { %p3425_p4 = por %p136_p2, %p135_p1  ;;  %s120_s8 = ssub.s32 %s3334_s25, %s4893_s29 }
  0x12   : > { %p2541_p6 = scmp.ge.s32.totalorder %s3338_s26, 1  ;;  %p123_p7 = scmp.eq.s32.totalorder %s120_s8, 0 }
  0x13   : > { %p3434_p8 = por %p142_p5, %p141_p3  ;;  %p266_p9 = scmp.lt.s32.totalorder %s3338_s26, 3 }
  0x14   : > { %s3440_s10 = scalar_select %p123_p7, %s3326_s23, %s125_s30  }
  0x15   : > { %p267_p10 = pnand %p2541_p6, %p266_p9 }
  0x17   : > { %270 = sbr.rel (%p267_p10) target bundleno = 629 (0x275), region = 32 }
  0x1e   : > { %p319_p11 = scmp.lt.s32.totalorder %s3330_s24, 1  ;;  %s4854_s1 = sld [smem:[#allocation25_spill]]  ;;  %vm397_vm0 = vcmask 1040384   ;;  %vm557_vm1 = vcmask 1046528   ;;  %v3340_v3 = vmov 0.0   ;;  %vm728_vm2 = vcmask 1045504  }
  0x1f   : > { %s4855_s0 = sld [smem:[#allocation24_spill]]  ;;  %v558_v4 = vrot.slane %v3340_v3, 1  ;;  %v729_v5 = vrot.slane %v3340_v3, 2  ;;  %s4848_s18 = smov 8   ;;  %vm1073_vm3 = vcmask 1043456   ;;  %vm899_vm4 = vcmask 64512  }
  0x20   : > { %s320_s11 = scalar_select %p319_p11, %s3330_s24, 1  ;;  %vm931_vm5 = vcmask 130048   ;;  %vm1024_vm6 = vcmask 195584  }
  0x21   : > { %s3342_s19 = smov 16   ;;  %s4867_s2 = sld [smem:[#allocation26_spill]] }
  0x22   : > { %s2636_s12 = sshll.u32 %s320_s11, 8  ;;  %s4845_s13 = sshll.u32 %s3330_s24, 12 }
  0x23   : > { %s4624_s20 = scalar_lea.hbm %s4828_s3, %s4845_s13 }
  0x24   : > { %v3154_v0 = vld [vmem:[%s4854_s1] sm:$0xff]   ;;  %v3155_v55 = vld [vmem:[%s4854_s1 + $0xc] sm:$0xff]  }
  0x25   : > { %s3450_s17 = scalar_lea.vmem %s4855_s0, %s2636_s12  ;;  %2746 = vmatprep.subr.bf16.mxu0 %v3154_v0  ;;  %2710 = vmatprep.subr.bf16.mxu1 %v3155_v55 }
  0x26   : > { %v333_v1 = vld [vmem:[%s3450_s17] sm:$0xff]  ;;  %v334_v2 = vld [vmem:[%s3450_s17 + $0x8] sm:$0xff]  ;;  %v3455_v6 = vld [vmem:[%s3450_s17 + $0x10] sm:$0xff]  ;;  %2747 = vmatpush3.bf16.msra.mxu0 %v3154_v0  ;;  %2711 = vmatpush3.bf16.msra.mxu1 %v3155_v55 }
  0x27   : > { %v398_v7 = vrot.slane %v333_v1, 7  ;;  %v399_v8 = vrot.slane %v334_v2, 7  ;;  %v3458_v9 = vld [vmem:[%s3450_s17 + $0x18] sm:$0xff]  ;;  %v401_v10 = vrot.slane %v3455_v6, 7  ;;  %v337_v11 = vld [vmem:[%s3450_s17 + $0x20] sm:$0xff]  ;;  %v338_v12 = vld [vmem:[%s3450_s17 + $0x28] sm:$0xff] }
  0x28   : > { %v402_v13 = vrot.slane %v3458_v9, 7  ;;  %v404_v15 = vrot.slane %v337_v11, 7  ;;  %v405_v16 = vrot.slane %v338_v12, 7  ;;  %v339_v41 = vld [vmem:[%s3450_s17 + $0x30] sm:$0xff]  ;;  %v340_v46 = vld [vmem:[%s3450_s17 + $0x38] sm:$0xff]  ;;  %v341_v0 = vld [vmem:[%s3450_s17 + $0x40] sm:$0xff] }
  0x29   : > { %v3467_v17 = vsel %vm397_vm0, %v398_v7, %v399_v8  ;;  %v3470_v18 = vsel %vm397_vm0, 0.0, %v398_v7  ;;  %v3473_v19 = vsel %vm397_vm0, 0.0, %v401_v10  ;;  %v510_v20 = vsel %vm397_vm0, %v399_v8, 0.0  ;;  %v342_v1 = vld [vmem:[%s3450_s17 + $0x48] sm:$0xff] }
  0x2a   : > { %v560_v21 = vrot.slane %v3470_v18, 1  ;;  %v561_v22 = vrot.slane %v3467_v17, 1  ;;  %v731_v23 = vrot.slane %v3470_v18, 2  ;;  %v732_v24 = vrot.slane %v3467_v17, 2 }
  0x2b   : > { %v3481_v25 = vsel %vm397_vm0, %v401_v10, %v402_v13  ;;  %v563_v26 = vrot.slane %v510_v20, 1  ;;  %v565_v27 = vrot.slane %v3473_v19, 1  ;;  %v734_v28 = vrot.slane %v510_v20, 2 }
  0x2c   : > { %v562_v29 = vsel %vm557_vm1, %v560_v21, %v561_v22  ;;  %v733_v30 = vsel %vm728_vm2, %v731_v23, %v732_v24  ;;  %v566_v31 = vrot.slane %v3481_v25, 1  ;;  %v736_v32 = vrot.slane %v3473_v19, 2 }
  0x2d   : > { %v2994_v33 = vpack.i.bf16 %v562_v29, %v558_v4  ;;  %v3004_v34 = vpack.i.bf16 %v733_v30, %v729_v5  ;;  %v564_v35 = vsel %vm557_vm1, %v561_v22, %v563_v26  ;;  %v735_v36 = vsel %vm728_vm2, %v732_v24, %v734_v28  ;;  %v3538_v24 = vld [vmem:[%s3450_s17 + $0x50] sm:$0xff]  ;;  %v3541_v26 = vld [vmem:[%s3450_s17 + $0x58] sm:$0xff] }
  0x2e   : > { %v567_v37 = vsel %vm557_vm1, %v565_v27, %v566_v31  ;;  %v737_v38 = vrot.slane %v3481_v25, 2  ;;  %v3493_v39 = vsel %vm397_vm0, %v404_v15, %v405_v16  ;;  %v3496_v40 = vsel %vm397_vm0, 0.0, %v404_v15 }
  0x2f   : > { %2995 = vrot.lane.b32.xlu0 %v2994_v33, %s4848_s18  ;;  %3005 = vrot.lane.b32.xlu1 %v3004_v34, %s3342_s19  ;;  %v2999_v42 = vpack.i.bf16 %v567_v37, %v564_v35  ;;  %v511_v43 = vsel %vm397_vm0, %v402_v13, 0.0  ;;  %v570_v44 = vrot.slane %v3496_v40, 1  ;;  %v571_v45 = vrot.slane %v3493_v39, 1 }
  0x30   : > { %v738_v47 = vsel %vm728_vm2, %v736_v32, %v737_v38  ;;  %v568_v48 = vrot.slane %v511_v43, 1  ;;  %v739_v49 = vrot.slane %v511_v43, 2  ;;  %v741_v50 = vrot.slane %v3496_v40, 2  ;;  %v3553_v32 = vld [vmem:[%s3450_s17 + $0x68] sm:$0xff] }
  0x31   : > { %v3009_v51 = vpack.i.bf16 %v738_v47, %v735_v36  ;;  %v572_v52 = vsel %vm557_vm1, %v570_v44, %v571_v45  ;;  %v742_v53 = vrot.slane %v3493_v39, 2  ;;  %v407_v54 = vrot.slane %v339_v41, 7 }
  0x32   : > { %v569_v56 = vsel %vm557_vm1, %v566_v31, %v568_v48  ;;  %v740_v57 = vsel %vm728_vm2, %v737_v38, %v739_v49  ;;  %v408_v58 = vrot.slane %v340_v46, 7  ;;  %v512_v59 = vsel %vm397_vm0, %v405_v16, 0.0  ;;  %v3550_v31 = vld [vmem:[%s3450_s17 + $0x60] sm:$0xff] }
  0x33   : > { %3000 = vrot.lane.b32.xlu0 %v2999_v42, %s4848_s18  ;;  %3010 = vrot.lane.b32.xlu1 %v3009_v51, %s3342_s19  ;;  %v3014_v60 = vpack.i.bf16 %v572_v52, %v569_v56  ;;  %v743_v61 = vsel %vm728_vm2, %v741_v50, %v742_v53  ;;  %v3519_v62 = vsel %vm397_vm0, 0.0, %v407_v54  ;;  %v573_v63 = vrot.slane %v512_v59, 1 }
  0x34   : > { %v3019_v2 = vpack.i.bf16 %v743_v61, %v740_v57  ;;  %v3524_v3 = vsel %vm397_vm0, %v407_v54, %v408_v58  ;;  %v575_v4 = vrot.slane %v3519_v62, 1  ;;  %v744_v5 = vrot.slane %v512_v59, 2 }
  0x35   : > { %v574_v7 = vsel %vm557_vm1, %v571_v45, %v573_v63  ;;  %v576_v8 = vrot.slane %v3524_v3, 1  ;;  %v746_v10 = vrot.slane %v3519_v62, 2  ;;  %v747_v11 = vrot.slane %v3524_v3, 2 }
  0x36   : > { %v745_v12 = vsel %vm728_vm2, %v742_v53, %v744_v5  ;;  %v410_v13 = vrot.slane %v341_v0, 7  ;;  %v411_v15 = vrot.slane %v342_v1, 7  ;;  %v513_v16 = vsel %vm397_vm0, %v408_v58, 0.0  ;;  %v3592_v0 = vld [vmem:[%s3450_s17 + $0x70] sm:$0xff] }
  0x37   : > { %3015 = vrot.lane.b32.xlu0 %v3014_v60, %s4848_s18  ;;  %3020 = vrot.lane.b32.xlu1 %v3019_v2, %s3342_s19  ;;  %v577_v20 = vsel %vm557_vm1, %v575_v4, %v576_v8  ;;  %v748_v21 = vsel %vm728_vm2, %v746_v10, %v747_v11  ;;  %v578_v22 = vrot.slane %v513_v16, 1  ;;  %v749_v23 = vrot.slane %v513_v16, 2 }
  0x38   : > { %v3024_v27 = vpack.i.bf16 %v577_v20, %v574_v7  ;;  %v3029_v28 = vpack.i.bf16 %v748_v21, %v745_v12  ;;  %v3544_v29 = vsel %vm397_vm0, %v410_v13, %v411_v15  ;;  %v3547_v30 = vsel %vm397_vm0, 0.0, %v410_v13  ;;  %v3597_v7 = vld [vmem:[%s3450_s17 + $0x78] sm:$0xff] }
  0x39   : > { %v579_v33 = vsel %vm557_vm1, %v576_v8, %v578_v22  ;;  %v580_v34 = vrot.slane %v3547_v30, 1  ;;  %v581_v35 = vrot.slane %v3544_v29, 1  ;;  %v750_v36 = vsel %vm728_vm2, %v747_v11, %v749_v23 }
  0x3a   : > { %v751_v37 = vrot.slane %v3547_v30, 2  ;;  %v752_v38 = vrot.slane %v3544_v29, 2  ;;  %v413_v41 = vrot.slane %v3538_v24, 7  ;;  %v414_v42 = vrot.slane %v3541_v26, 7 }
  0x3b   : > { %3025 = vrot.lane.b32.xlu0 %v3024_v27, %s4848_s18  ;;  %3030 = vrot.lane.b32.xlu1 %v3029_v28, %s3342_s19  ;;  %v582_v43 = vsel %vm557_vm1, %v580_v34, %v581_v35  ;;  %v514_v44 = vsel %vm397_vm0, %v411_v15, 0.0  ;;  %v416_v45 = vrot.slane %v3550_v31, 7  ;;  %v417_v46 = vrot.slane %v3553_v32, 7 }
  0x3c   : > { %v3034_v47 = vpack.i.bf16 %v582_v43, %v579_v33  ;;  %v753_v48 = vsel %vm728_vm2, %v751_v37, %v752_v38  ;;  %v3571_v49 = vsel %vm397_vm0, %v413_v41, %v414_v42  ;;  %v3574_v50 = vsel %vm397_vm0, 0.0, %v413_v41  ;;  %v3619_v37 = vld [vmem:[%s3450_s17 + $0x88] sm:$0xff] }
  0x3d   : > { %v3039_v51 = vpack.i.bf16 %v753_v48, %v750_v36  ;;  %v583_v52 = vrot.slane %v514_v44, 1  ;;  %v585_v53 = vrot.slane %v3574_v50, 1  ;;  %v586_v54 = vrot.slane %v3571_v49, 1  ;;  %v3616_v36 = vld [vmem:[%s3450_s17 + $0x80] sm:$0xff] }
  0x3e   : > { %v754_v55 = vrot.slane %v514_v44, 2  ;;  %v756_v56 = vrot.slane %v3574_v50, 2  ;;  %v757_v57 = vrot.slane %v3571_v49, 2  ;;  %v3581_v58 = vsel %vm397_vm0, %v416_v45, %v417_v46 }
  0x3f   : > { %3035 = vrot.lane.b32.xlu0 %v3034_v47, %s4848_s18  ;;  %3040 = vrot.lane.b32.xlu1 %v3039_v51, %s3342_s19  ;;  %v584_v59 = vsel %vm557_vm1, %v581_v35, %v583_v52  ;;  %v587_v60 = vsel %vm557_vm1, %v585_v53, %v586_v54  ;;  %v3588_v61 = vsel %vm397_vm0, 0.0, %v416_v45  ;;  %v515_v63 = vsel %vm397_vm0, %v414_v42, 0.0 }
  0x40   : > { %v3044_v1 = vpack.i.bf16 %v587_v60, %v584_v59  ;;  %v755_v2 = vsel %vm728_vm2, %v752_v38, %v754_v55  ;;  %v758_v4 = vsel %vm728_vm2, %v756_v56, %v757_v57  ;;  %v588_v5 = vrot.slane %v515_v63, 1  ;;  %v3638_v59 = vld [vmem:[%s3450_s17 + $0x90] sm:$0xff]  ;;  %v3641_v60 = vld [vmem:[%s3450_s17 + $0x98] sm:$0xff] }
  0x41   : > { %v3049_v8 = vpack.i.bf16 %v758_v4, %v755_v2  ;;  %v590_v10 = vrot.slane %v3588_v61, 1  ;;  %v591_v11 = vrot.slane %v3581_v58, 1  ;;  %v759_v12 = vrot.slane %v515_v63, 2 }
  0x42   : > { %v589_v13 = vsel %vm557_vm1, %v586_v54, %v588_v5  ;;  %v761_v15 = vrot.slane %v3588_v61, 2  ;;  %v762_v16 = vrot.slane %v3581_v58, 2  ;;  %v419_v20 = vrot.slane %v3592_v0, 7  ;;  %v3650_v5 = vld [vmem:[%s3450_s17 + $0xa0] sm:$0xff] }
  0x43   : > { %3045 = vrot.lane.b32.xlu0 %v3044_v1, %s4848_s18  ;;  %3050 = vrot.lane.b32.xlu1 %v3049_v8, %s3342_s19  ;;  %v592_v21 = vsel %vm557_vm1, %v590_v10, %v591_v11  ;;  %v760_v22 = vsel %vm728_vm2, %v757_v57, %v759_v12  ;;  %v420_v23 = vrot.slane %v3597_v7, 7  ;;  %v516_v27 = vsel %vm397_vm0, %v417_v46, 0.0  ;;  %v3653_v8 = vld [vmem:[%s3450_s17 + $0xa8] sm:$0xff] }
  0x44   : > { %v3054_v28 = vpack.i.bf16 %v592_v21, %v589_v13  ;;  %v763_v33 = vsel %vm728_vm2, %v761_v15, %v762_v16  ;;  %v3613_v34 = vsel %vm397_vm0, 0.0, %v419_v20  ;;  %v593_v35 = vrot.slane %v516_v27, 1  ;;  %4856 = vst [vmem:[#allocation12_spill] sm:$0xff] %v3653_v8 }
  0x45   : > { %v3059_v38 = vpack.i.bf16 %v763_v33, %v760_v22  ;;  %v3622_v41 = vsel %vm397_vm0, %v419_v20, %v420_v23  ;;  %v595_v42 = vrot.slane %v3613_v34, 1  ;;  %v764_v43 = vrot.slane %v516_v27, 2 }
  0x46   : > { %v594_v44 = vsel %vm557_vm1, %v591_v11, %v593_v35  ;;  %v596_v45 = vrot.slane %v3622_v41, 1  ;;  %v766_v46 = vrot.slane %v3613_v34, 2  ;;  %v767_v47 = vrot.slane %v3622_v41, 2 }
  0x47   : > { %3055 = vrot.lane.b32.xlu0 %v3054_v28, %s4848_s18  ;;  %3060 = vrot.lane.b32.xlu1 %v3059_v38, %s3342_s19  ;;  %v765_v48 = vsel %vm728_vm2, %v762_v16, %v764_v43  ;;  %v422_v51 = vrot.slane %v3616_v36, 7  ;;  %v423_v52 = vrot.slane %v3619_v37, 7  ;;  %v517_v53 = vsel %vm397_vm0, %v420_v23, 0.0 }
  0x48   : > { %v597_v54 = vsel %vm557_vm1, %v595_v42, %v596_v45  ;;  %v768_v55 = vsel %vm728_vm2, %v766_v46, %v767_v47  ;;  %v598_v56 = vrot.slane %v517_v53, 1  ;;  %v769_v57 = vrot.slane %v517_v53, 2 }
  0x49   : > { %v3064_v63 = vpack.i.bf16 %v597_v54, %v594_v44  ;;  %v3069_v1 = vpack.i.bf16 %v768_v55, %v765_v48  ;;  %v3644_v2 = vsel %vm397_vm0, %v422_v51, %v423_v52  ;;  %v3647_v4 = vsel %vm397_vm0, 0.0, %v422_v51 }
  0x4a   : > { %v599_v10 = vsel %vm557_vm1, %v596_v45, %v598_v56  ;;  %v600_v11 = vrot.slane %v3647_v4, 1  ;;  %v601_v12 = vrot.slane %v3644_v2, 1  ;;  %v770_v13 = vsel %vm728_vm2, %v767_v47, %v769_v57  ;;  %v3692_v57 = vld [vmem:[%s3450_s17 + $0xb0] sm:$0xff] }
  0x4b   : > { %3065 = vrot.lane.b32.xlu0 %v3064_v63, %s4848_s18  ;;  %3070 = vrot.lane.b32.xlu1 %v3069_v1, %s3342_s19  ;;  %v771_v15 = vrot.slane %v3647_v4, 2  ;;  %v772_v16 = vrot.slane %v3644_v2, 2  ;;  %v425_v20 = vrot.slane %v3638_v59, 7  ;;  %v426_v21 = vrot.slane %v3641_v60, 7  ;;  %4857 = vst [vmem:[#allocation13_spill] sm:$0xff] %v3692_v57 }
  0x4c   : > { %v602_v22 = vsel %vm557_vm1, %v600_v11, %v601_v12  ;;  %v518_v23 = vsel %vm397_vm0, %v423_v52, 0.0  ;;  %v428_v27 = vrot.slane %v3650_v5, 7  ;;  %v429_v28 = vrot.slane %v3653_v8, 7  ;;  %v3797_v8 = vld [vmem:[%s3450_s17 + $0xf8] sm:$0xff] }
  0x4d   : > { %v3074_v33 = vpack.i.bf16 %v602_v22, %v599_v10  ;;  %v773_v35 = vsel %vm728_vm2, %v771_v15, %v772_v16  ;;  %v3671_v38 = vsel %vm397_vm0, %v425_v20, %v426_v21  ;;  %v3674_v42 = vsel %vm397_vm0, 0.0, %v425_v20  ;;  %4866 = vst [vmem:[#allocation22_spill] sm:$0xff] %v3797_v8 }
  0x4e   : > { %v3079_v43 = vpack.i.bf16 %v773_v35, %v770_v13  ;;  %v603_v44 = vrot.slane %v518_v23, 1  ;;  %v605_v45 = vrot.slane %v3674_v42, 1  ;;  %v606_v46 = vrot.slane %v3671_v38, 1  ;;  %v3697_v13 = vld [vmem:[%s3450_s17 + $0xb8] sm:$0xff] }
  0x4f   : > { %3075 = vrot.lane.b32.xlu0 %v3074_v33, %s4848_s18  ;;  %v774_v47 = vrot.slane %v518_v23, 2  ;;  %v776_v48 = vrot.slane %v3674_v42, 2  ;;  %v777_v51 = vrot.slane %v3671_v38, 2  ;;  %v3682_v52 = vsel %vm397_vm0, %v428_v27, %v429_v28  ;;  %4858 = vst [vmem:[#allocation14_spill] sm:$0xff] %v3697_v13 }
  0x50   : > { %3080 = vrot.lane.b32.xlu1 %v3079_v43, %s3342_s19  ;;  %v604_v53 = vsel %vm557_vm1, %v601_v12, %v603_v44  ;;  %v607_v54 = vsel %vm557_vm1, %v605_v45, %v606_v46  ;;  %v3688_v55 = vsel %vm397_vm0, 0.0, %v428_v27  ;;  %v519_v56 = vsel %vm397_vm0, %v426_v21, 0.0 }
  0x51   : > { %v3084_v63 = vpack.i.bf16 %v607_v54, %v604_v53  ;;  %v775_v1 = vsel %vm728_vm2, %v772_v16, %v774_v47  ;;  %v778_v10 = vsel %vm728_vm2, %v776_v48, %v777_v51  ;;  %v608_v11 = vrot.slane %v519_v56, 1  ;;  %v3716_v53 = vld [vmem:[%s3450_s17 + $0xc0] sm:$0xff]  ;;  %v3719_v54 = vld [vmem:[%s3450_s17 + $0xc8] sm:$0xff] }
  0x52   : > { %v3089_v15 = vpack.i.bf16 %v778_v10, %v775_v1  ;;  %v610_v12 = vrot.slane %v3688_v55, 1  ;;  %v611_v20 = vrot.slane %v3682_v52, 1  ;;  %v779_v22 = vrot.slane %v519_v56, 2  ;;  %4859 = vst [vmem:[#allocation15_spill] sm:$0xff] %v3716_v53  ;;  %4860 = vst [vmem:[#allocation16_spill] sm:$0xff] %v3719_v54 }
  0x53   : > { %3085 = vrot.lane.b32.xlu0 %v3084_v63, %s4848_s18  ;;  %v609_v21 = vsel %vm557_vm1, %v606_v46, %v608_v11  ;;  %v781_v23 = vrot.slane %v3688_v55, 2  ;;  %v782_v16 = vrot.slane %v3682_v52, 2  ;;  %v431_v27 = vrot.slane %v3692_v57, 7 }
  0x54   : > { %3090 = vrot.lane.b32.xlu1 %v3089_v15, %s3342_s19  ;;  %v612_v33 = vsel %vm557_vm1, %v610_v12, %v611_v20  ;;  %v780_v35 = vsel %vm728_vm2, %v777_v51, %v779_v22  ;;  %v432_v43 = vrot.slane %v3697_v13, 7  ;;  %v520_v44 = vsel %vm397_vm0, %v429_v28, 0.0 }
  0x55   : > { %v3094_v45 = vpack.i.bf16 %v612_v33, %v609_v21  ;;  %v783_v47 = vsel %vm728_vm2, %v781_v23, %v782_v16  ;;  %v3713_v46 = vsel %vm397_vm0, 0.0, %v431_v27  ;;  %v613_v48 = vrot.slane %v520_v44, 1 }
  0x56   : > { %v3099_v56 = vpack.i.bf16 %v783_v47, %v780_v35  ;;  %v3722_v63 = vsel %vm397_vm0, %v431_v27, %v432_v43  ;;  %v615_v51 = vrot.slane %v3713_v46, 1  ;;  %v784_v1 = vrot.slane %v520_v44, 2  ;;  %v3738_v44 = vld [vmem:[%s3450_s17 + $0xd0] sm:$0xff] }
  0x57   : > { %3095 = vrot.lane.b32.xlu0 %v3094_v45, %s4848_s18  ;;  %v614_v28 = vsel %vm557_vm1, %v611_v20, %v613_v48  ;;  %v616_v10 = vrot.slane %v3722_v63, 1  ;;  %v786_v11 = vrot.slane %v3713_v46, 2  ;;  %v787_v15 = vrot.slane %v3722_v63, 2  ;;  %4861 = vst [vmem:[#allocation17_spill] sm:$0xff] %v3738_v44  ;;  %v3741_v45 = vld [vmem:[%s3450_s17 + $0xd8] sm:$0xff] }
  0x58   : > { %3100 = vrot.lane.b32.xlu1 %v3099_v56, %s3342_s19  ;;  %v785_v12 = vsel %vm728_vm2, %v782_v16, %v784_v1  ;;  %v434_v22 = vrot.slane %v3716_v53, 7  ;;  %v435_v21 = vrot.slane %v3719_v54, 7  ;;  %v521_v23 = vsel %vm397_vm0, %v432_v43, 0.0  ;;  %4862 = vst [vmem:[#allocation18_spill] sm:$0xff] %v3741_v45  ;;  %v3750_v1 = vld [vmem:[%s3450_s17 + $0xe0] sm:$0xff]  ;;  %v3753_v43 = vld [vmem:[%s3450_s17 + $0xe8] sm:$0xff] }
  0x59   : > { %v617_v20 = vsel %vm557_vm1, %v615_v51, %v616_v10  ;;  %v788_v27 = vsel %vm728_vm2, %v786_v11, %v787_v15  ;;  %v618_v33 = vrot.slane %v521_v23, 1  ;;  %v789_v35 = vrot.slane %v521_v23, 2  ;;  %4863 = vst [vmem:[#allocation19_spill] sm:$0xff] %v3750_v1  ;;  %4864 = vst [vmem:[#allocation20_spill] sm:$0xff] %v3753_v43 }
  0x5a   : > { %v3104_v47 = vpack.i.bf16 %v617_v20, %v614_v28  ;;  %v3109_v48 = vpack.i.bf16 %v788_v27, %v785_v12  ;;  %v3744_v16 = vsel %vm397_vm0, %v434_v22, %v435_v21  ;;  %v3747_v56 = vsel %vm397_vm0, 0.0, %v434_v22 }
  0x5b   : > { %v619_v51 = vsel %vm557_vm1, %v616_v10, %v618_v33  ;;  %v620_v11 = vrot.slane %v3747_v56, 1  ;;  %v621_v23 = vrot.slane %v3744_v16, 1  ;;  %v790_v14 = vsel %vm728_vm2, %v787_v15, %v789_v35 }
  0x5c   : > { %3105 = vrot.lane.b32.xlu0 %v3104_v47, %s4848_s18  ;;  %3110 = vrot.lane.b32.xlu1 %v3109_v48, %s3342_s19  ;;  %v791_v28 = vrot.slane %v3747_v56, 2  ;;  %v792_v12 = vrot.slane %v3744_v16, 2  ;;  %v437_v22 = vrot.slane %v3738_v44, 7  ;;  %v438_v20 = vrot.slane %v3741_v45, 7 }
  0x5d   : > { %v622_v10 = vsel %vm557_vm1, %v620_v11, %v621_v23  ;;  %v522_v27 = vsel %vm397_vm0, %v435_v21, 0.0  ;;  %v440_v33 = vrot.slane %v3750_v1, 7  ;;  %v441_v15 = vrot.slane %v3753_v43, 7 }
  0x5e   : > { %v3114_v35 = vpack.i.bf16 %v622_v10, %v619_v51  ;;  %v793_v47 = vsel %vm728_vm2, %v791_v28, %v792_v12  ;;  %v3771_v48 = vsel %vm397_vm0, %v437_v22, %v438_v20  ;;  %v3774_v54 = vsel %vm397_vm0, 0.0, %v437_v22 }
  0x5f   : > { %v3119_v44 = vpack.i.bf16 %v793_v47, %v790_v14  ;;  %v623_v45 = vrot.slane %v522_v27, 1  ;;  %v625_v11 = vrot.slane %v3774_v54, 1  ;;  %v626_v21 = vrot.slane %v3771_v48, 1 }
  0x60   : > { %3115 = vrot.lane.b32.xlu0 %v3114_v35, %s4848_s18  ;;  %v794_v43 = vrot.slane %v522_v27, 2  ;;  %v796_v51 = vrot.slane %v3774_v54, 2  ;;  %v797_v28 = vrot.slane %v3771_v48, 2  ;;  %v3782_v10 = vsel %vm397_vm0, %v440_v33, %v441_v15  ;;  %v3792_v35 = vld [vmem:[%s3450_s17 + $0xf0] sm:$0xff] }
  0x61   : > { %3120 = vrot.lane.b32.xlu1 %v3119_v44, %s3342_s19  ;;  %v624_v14 = vsel %vm557_vm1, %v621_v23, %v623_v45  ;;  %v627_v22 = vsel %vm557_vm1, %v625_v11, %v626_v21  ;;  %v3788_v47 = vsel %vm397_vm0, 0.0, %v440_v33  ;;  %v523_v1 = vsel %vm397_vm0, %v438_v20, 0.0  ;;  %4865 = vst [vmem:[#allocation21_spill] sm:$0xff] %v3792_v35 }
  0x62   : > { %v3124_v27 = vpack.i.bf16 %v627_v22, %v624_v14  ;;  %v795_v53 = vsel %vm728_vm2, %v792_v12, %v794_v43  ;;  %v798_v13 = vsel %vm728_vm2, %v796_v51, %v797_v28  ;;  %v628_v57 = vrot.slane %v523_v1, 1 }
  0x63   : > { %v3129_v44 = vpack.i.bf16 %v798_v13, %v795_v53  ;;  %v630_v45 = vrot.slane %v3788_v47, 1  ;;  %v631_v23 = vrot.slane %v3782_v10, 1  ;;  %v799_v11 = vrot.slane %v523_v1, 2 }
  0x64   : > { %3125 = vrot.lane.b32.xlu0 %v3124_v27, %s4848_s18  ;;  %v629_v20 = vsel %vm557_vm1, %v626_v21, %v628_v57  ;;  %v801_v33 = vrot.slane %v3788_v47, 2  ;;  %v802_v14 = vrot.slane %v3782_v10, 2  ;;  %v443_v43 = vrot.slane %v3792_v35, 7  ;;  %v3156_v27 = vld [vmem:[%s4854_s1 + $0x8] ss:$0 sps:$4 sm:$0xff]  }
  0x65   : > { %3130 = vrot.lane.b32.xlu1 %v3129_v44, %s3342_s19  ;;  %v632_v12 = vsel %vm557_vm1, %v630_v45, %v631_v23  ;;  %v800_v13 = vsel %vm728_vm2, %v797_v28, %v799_v11  ;;  %v444_v53 = vrot.slane %v3797_v8, 7  ;;  %v524_v1 = vsel %vm397_vm0, %v441_v15, 0.0  ;;  %v3157_v44 = vld [vmem:[%s4854_s1 + $0x14] ss:$0 sps:$4 sm:$0xff]   ;;  %2917 = vmatprep.subr.msk.bf16.mxu0 %vm1073_vm3, %v3156_v27 }
  0x66   : > { %v3134_v51 = vpack.i.bf16 %v632_v12, %v629_v20  ;;  %v803_v22 = vsel %vm728_vm2, %v801_v33, %v802_v14  ;;  %v3813_v57 = vsel %vm397_vm0, 0.0, %v443_v43  ;;  %v633_v21 = vrot.slane %v524_v1, 1  ;;  %2916 = vmatprep.subr.msk.bf16.mxu1 %vm1073_vm3, %v3157_v44 }
  0x67   : > { %v3139_v28 = vpack.i.bf16 %v803_v22, %v800_v13  ;;  %v3822_v45 = vsel %vm397_vm0, %v443_v43, %v444_v53  ;;  %v984_v15 = vrot.slane %v3813_v57, 1  ;;  %v804_v11 = vrot.slane %v524_v1, 2 }
  0x68   : > { %3135 = vrot.lane.b32.xlu0 %v3134_v51, %s4848_s18  ;;  %v634_v20 = vsel %vm557_vm1, %v631_v23, %v633_v21  ;;  %v985_v33 = vrot.slane %v3822_v45, 1  ;;  %v995_v12 = vrot.slane %v3813_v57, 2  ;;  %v996_v8 = vrot.slane %v3822_v45, 2  ;;  %v3158_v23 = vld [vmem:[%s4854_s1 + $0x18] sm:$0xff]  }
  0x69   : > { %3140 = vrot.lane.b32.xlu1 %v3139_v28, %s3342_s19  ;;  %v805_v13 = vsel %vm728_vm2, %v802_v14, %v804_v11  ;;  %v525_v43 = vsel %vm397_vm0, %v444_v53, 0.0  ;;  %v1251_v14 = vsel %vm1073_vm3, %v3156_v27, 0  ;;  %v1075_v53 = vsel %vm1073_vm3, %v3157_v44, 0 }
  0x6a   : > { %v986_v22 = vsel %vm557_vm1, %v984_v15, %v985_v33  ;;  %v997_v1 = vsel %vm728_vm2, %v995_v12, %v996_v8  ;;  %v987_v51 = vrot.slane %v525_v43, 1  ;;  %v998_v35 = vrot.slane %v525_v43, 2  ;;  %v1844_v15 = vld [vmem:[%s4867_s2] sm:$0xf]  ;;  %2749 = vmatpush3.bf16.msra.mxu0 %v1251_v14  ;;  %2713 = vmatpush3.bf16.msra.mxu1 %v1075_v53 }
  0x6b   : > { %v3144_v21 = vpack.i.bf16 %v986_v22, %v634_v20  ;;  %v3149_v28 = vpack.i.bf16 %v997_v1, %v805_v13  ;;  %2782 = vmatprep.subr.bf16.mxu0 %v3158_v23  ;;  %2919 = vmatprep.subr.msk.bf16.mxu1 %vm1073_vm3, %v1844_v15 }
  0x6c   : > { %v988_v11 = vsel %vm557_vm1, %v985_v33, %v987_v51  ;;  %v999_v12 = vsel %vm728_vm2, %v996_v8, %v998_v35 }
  0x6d   : > { %3145 = vrot.lane.b32.xlu0 %v3144_v21, %s4848_s18  ;;  %3150 = vrot.lane.b32.xlu1 %v3149_v28, %s3342_s19 }
  0x71   : > { %991 = vrot.lane.b32.xlu0 %v988_v11, %s4848_s18  ;;  %1002 = vrot.lane.b32.xlu1 %v999_v12, %s3342_s19 }
  0xa1   : > { %v2996_v27 = vpop.permute.xlu0 %2995  ;;  %v3006_v44 = vpop.permute.xlu1 %3005 }
  0xa2   : > { %v2998_v20 = vunpack.i.h.bf16 %v2996_v27  ;;  %v2997_v13 = vunpack.i.l.bf16 %v2996_v27  ;;  %v3007_v43 = vunpack.i.l.bf16 %v3006_v44  ;;  %v3008_v1 = vunpack.i.h.bf16 %v3006_v44 }
  0xa4   : > { %v900_v22 = vsel %vm899_vm4, 0.0, %v2997_v13  ;;  %v901_v14 = vsel %vm899_vm4, %v3470_v18, %v2998_v20 }
  0xa5   : > { %v3001_v33 = vpop.permute.xlu0 %3000  ;;  %v3011_v51 = vpop.permute.xlu1 %3010  ;;  %v932_v8 = vsel %vm931_vm5, %v900_v22, %v3007_v43  ;;  %v933_v13 = vsel %vm931_vm5, %v901_v14, %v3008_v1 }
  0xa6   : > { %v3003_v35 = vunpack.i.h.bf16 %v3001_v33  ;;  %v3002_v21 = vunpack.i.l.bf16 %v3001_v33  ;;  %v3012_v28 = vunpack.i.l.bf16 %v3011_v51  ;;  %v3856_v53 = vpack.c.bf16 %v932_v8, %v932_v8 }
  0xa7   : > { %v3013_v12 = vunpack.i.h.bf16 %v3011_v51 }
  0xa8   : > { %4868 = vst [vmem:[#allocation23_spill] sm:$0xff] %v3856_v53  ;;  %v902_v11 = vsel %vm899_vm4, %v3467_v17, %v3002_v21  ;;  %2750 = vmatprep.mubr.msk.bf16.mxu0 %vm1024_vm6, %v3856_v53  ;;  %v903_v22 = vsel %vm899_vm4, %v3473_v19, %v3003_v35  ;;  %v3159_v17 = vld [vmem:[%s4854_s1 + $0x20] ss:$0 sps:$4 sm:$0xff]  }
  0xa9   : > { %v3016_v27 = vpop.permute.xlu0 %3015  ;;  %v3021_v44 = vpop.permute.xlu1 %3020  ;;  %v934_v43 = vsel %vm931_vm5, %v902_v11, %v3012_v28  ;;  %v935_v21 = vsel %vm931_vm5, %v903_v22, %v3013_v12  ;;  %v1894_v28 = vsel %vm1073_vm3, %v1844_v15, 0 }
  0xaa   : > { %v3018_v33 = vunpack.i.h.bf16 %v3016_v27  ;;  %v3017_v18 = vunpack.i.l.bf16 %v3016_v27  ;;  %v3022_v20 = vunpack.i.l.bf16 %v3021_v44  ;;  %v964_v8 = vpack.c.bf16 %v934_v43, %v933_v13 }
  0xab   : > { %v3023_v53 = vunpack.i.h.bf16 %v3021_v44  ;;  %v1428_v44 = vsel %vm1073_vm3, %v3159_v17, 0 }
  0xac   : > { %v904_v51 = vsel %vm899_vm4, %v3481_v25, %v3017_v18  ;;  %2714 = vmatprep.mubr.msk.bf16.mxu1 %vm1024_vm6, %v964_v8  ;;  %2751 = vmatmul.mubr.msk.bf16.vlgmr.msra.gmra.mrb[0].mxu0 %vm1024_vm6, %v964_v8  ;;  %v905_v14 = vsel %vm899_vm4, %v3496_v40, %v3018_v33 }
  0xad   : > { %v936_v1 = vsel %vm931_vm5, %v904_v51, %v3022_v20  ;;  %v3026_v19 = vpop.permute.xlu0 %3025  ;;  %v3031_v35 = vpop.permute.xlu1 %3030  ;;  %2783 = vmatpush3.bf16.msra.mxu0 %v3158_v23  ;;  %v937_v40 = vsel %vm931_vm5, %v905_v14, %v3023_v53 }
  0xae   : > { %v3878_v11 = vpack.c.bf16 %v936_v1, %v935_v21  ;;  %v3028_v27 = vunpack.i.h.bf16 %v3026_v19  ;;  %v3027_v25 = vunpack.i.l.bf16 %v3026_v19  ;;  %v3032_v12 = vunpack.i.l.bf16 %v3031_v35  ;;  %2918 = vmatprep.subr.msk.bf16.mxu0 %vm1073_vm3, %v3159_v17 }
  0xaf   : > { %v3033_v15 = vunpack.i.h.bf16 %v3031_v35 }
  0xb0   : > { %v906_v13 = vsel %vm899_vm4, %v3493_v39, %v3027_v25  ;;  %2715 = vmatmul.mubr.msk.bf16.vlgmr.msra.gmra.mrb[0].mxu1 %vm1024_vm6, %v3878_v11  ;;  %2754 = vmatprep.mubr.msk.bf16.mxu0 %vm1024_vm6, %v3878_v11  ;;  %v907_v33 = vsel %vm899_vm4, %v3519_v62, %v3028_v27 }
  0xb1   : > { %v938_v43 = vsel %vm931_vm5, %v906_v13, %v3032_v12  ;;  %2819 = vmatpush3.bf16.msra.mxu1 %v1894_v28  ;;  %v3036_v23 = vpop.permute.xlu0 %3035  ;;  %v3041_v22 = vpop.permute.xlu1 %3040  ;;  %2785 = vmatpush3.bf16.msra.mxu0 %v1428_v44  ;;  %v939_v53 = vsel %vm931_vm5, %v907_v33, %v3033_v15 }
  0xb2   : > { %v3892_v18 = vpack.c.bf16 %v938_v43, %v937_v40  ;;  %v3038_v39 = vunpack.i.h.bf16 %v3036_v23  ;;  %v3037_v20 = vunpack.i.l.bf16 %v3036_v23  ;;  %v3042_v8 = vunpack.i.l.bf16 %v3041_v22 }
  0xb3   : > { %v3043_v51 = vunpack.i.h.bf16 %v3041_v22 }
  0xb4   : > { %v908_v17 = vsel %vm899_vm4, %v3524_v3, %v3037_v20  ;;  %2718 = vmatprep.mubr.msk.bf16.mxu1 %vm1024_vm6, %v3892_v18  ;;  %2755 = vmatmul.mubr.msk.bf16.gmra.mrb[4].mxu0 %vm1024_vm6, %v3892_v18  ;;  %v909_v19 = vsel %vm899_vm4, %v3547_v30, %v3038_v39 }
  0xb5   : > { %v940_v21 = vsel %vm931_vm5, %v908_v17, %v3042_v8  ;;  %v3046_v62 = vpop.permute.xlu0 %3045  ;;  %v3051_v1 = vpop.permute.xlu1 %3050  ;;  %v941_v25 = vsel %vm931_vm5, %v909_v19, %v3043_v51 }
  0xb6   : > { %v3904_v35 = vpack.c.bf16 %v940_v21, %v939_v53  ;;  %v3048_v28 = vunpack.i.h.bf16 %v3046_v62  ;;  %v3047_v3 = vunpack.i.l.bf16 %v3046_v62  ;;  %v3052_v14 = vunpack.i.l.bf16 %v3051_v1 }
  0xb7   : > { %v3053_v12 = vunpack.i.h.bf16 %v3051_v1 }
  0xb8   : > { %v910_v27 = vsel %vm899_vm4, %v3544_v29, %v3047_v3  ;;  %2719 = vmatmul.mubr.msk.bf16.gmra.mrb[4].mxu1 %vm1024_vm6, %v3904_v35  ;;  %2758 = vmatprep.mubr.msk.bf16.mxu0 %vm1024_vm6, %v3904_v35  ;;  %v911_v40 = vsel %vm899_vm4, %v3574_v50, %v3048_v28 }
  0xb9   : > { %v942_v44 = vsel %vm931_vm5, %v910_v27, %v3052_v14  ;;  %v3056_v30 = vpop.permute.xlu0 %3055  ;;  %v3061_v13 = vpop.permute.xlu1 %3060  ;;  %v943_v33 = vsel %vm931_vm5, %v911_v40, %v3053_v12 }
  0xba   : > { %v3916_v15 = vpack.c.bf16 %v942_v44, %v941_v25  ;;  %v3058_v43 = vunpack.i.h.bf16 %v3056_v30  ;;  %v3057_v29 = vunpack.i.l.bf16 %v3056_v30  ;;  %v3062_v23 = vunpack.i.l.bf16 %v3061_v13 }
  0xbb   : > { %v3063_v39 = vunpack.i.h.bf16 %v3061_v13 }
  0xbc   : > { %v912_v22 = vsel %vm899_vm4, %v3571_v49, %v3057_v29  ;;  %2722 = vmatprep.mubr.msk.bf16.mxu1 %vm1024_vm6, %v3916_v15  ;;  %2759 = vmatmul.mubr.msk.bf16.gmra.mrb[8].mxu0 %vm1024_vm6, %v3916_v15  ;;  %v913_v17 = vsel %vm899_vm4, %v3588_v61, %v3058_v43 }
  0xbd   : > { %v944_v20 = vsel %vm931_vm5, %v912_v22, %v3062_v23  ;;  %v3066_v50 = vpop.permute.xlu0 %3065  ;;  %v3071_v8 = vpop.permute.xlu1 %3070  ;;  %v945_v1 = vsel %vm931_vm5, %v913_v17, %v3063_v39 }
  0xbe   : > { %v3928_v53 = vpack.c.bf16 %v944_v20, %v943_v33  ;;  %v3068_v51 = vunpack.i.h.bf16 %v3066_v50  ;;  %v3067_v49 = vunpack.i.l.bf16 %v3066_v50  ;;  %v3072_v21 = vunpack.i.l.bf16 %v3071_v8 }
  0xbf   : > { %v3073_v19 = vunpack.i.h.bf16 %v3071_v8 }
  0xc0   : > { %v914_v62 = vsel %vm899_vm4, %v3581_v58, %v3067_v49  ;;  %2723 = vmatmul.mubr.msk.bf16.gmra.mrb[8].mxu1 %vm1024_vm6, %v3928_v53  ;;  %2762 = vmatprep.mubr.msk.bf16.mxu0 %vm1024_vm6, %v3928_v53  ;;  %v915_v3 = vsel %vm899_vm4, %v3613_v34, %v3068_v51 }
  0xc1   : > { %v946_v28 = vsel %vm931_vm5, %v914_v62, %v3072_v21  ;;  %v3076_v61 = vpop.permute.xlu0 %3075  ;;  %v947_v30 = vsel %vm931_vm5, %v915_v3, %v3073_v19 }
  0xc2   : > { %v3940_v14 = vpack.c.bf16 %v946_v28, %v945_v1  ;;  %v3078_v27 = vunpack.i.h.bf16 %v3076_v61  ;;  %v3077_v25 = vunpack.i.l.bf16 %v3076_v61  ;;  %v3081_v58 = vpop.permute.xlu1 %3080 }
  0xc3   : > { %v3082_v12 = vunpack.i.l.bf16 %v3081_v58  ;;  %v3083_v13 = vunpack.i.h.bf16 %v3081_v58 }
  0xc4   : > { %v916_v44 = vsel %vm899_vm4, %v3622_v41, %v3077_v25  ;;  %2726 = vmatprep.mubr.msk.bf16.mxu1 %vm1024_vm6, %v3940_v14  ;;  %2763 = vmatmul.mubr.msk.bf16.gmra.mrb[12].mxu0 %vm1024_vm6, %v3940_v14  ;;  %v917_v43 = vsel %vm899_vm4, %v3647_v4, %v3078_v27 }
  0xc5   : > { %v948_v40 = vsel %vm931_vm5, %v916_v44, %v3082_v12  ;;  %v3086_v34 = vpop.permute.xlu0 %3085  ;;  %v949_v20 = vsel %vm931_vm5, %v917_v43, %v3083_v13 }
  0xc6   : > { %v3952_v29 = vpack.c.bf16 %v948_v40, %v947_v30  ;;  %v3088_v23 = vunpack.i.h.bf16 %v3086_v34  ;;  %v3087_v22 = vunpack.i.l.bf16 %v3086_v34  ;;  %v3091_v41 = vpop.permute.xlu1 %3090 }
  0xc7   : > { %v3092_v33 = vunpack.i.l.bf16 %v3091_v41  ;;  %v3093_v50 = vunpack.i.h.bf16 %v3091_v41 }
  0xc8   : > { %v918_v39 = vsel %vm899_vm4, %v3644_v2, %v3087_v22  ;;  %2727 = vmatmul.mubr.msk.bf16.gmra.mrb[12].mxu1 %vm1024_vm6, %v3952_v29  ;;  %2766 = vmatprep.mubr.msk.bf16.mxu0 %vm1024_vm6, %v3952_v29  ;;  %v919_v17 = vsel %vm899_vm4, %v3674_v42, %v3088_v23 }
  0xc9   : > { %v950_v4 = vsel %vm931_vm5, %v918_v39, %v3092_v33  ;;  %v3096_v8 = vpop.permute.xlu0 %3095  ;;  %v951_v19 = vsel %vm931_vm5, %v919_v17, %v3093_v50 }
  0xca   : > { %v3964_v51 = vpack.c.bf16 %v950_v4, %v949_v20  ;;  %v3097_v49 = vunpack.i.l.bf16 %v3096_v8  ;;  %v3101_v21 = vpop.permute.xlu1 %3100  ;;  %v3098_v2 = vunpack.i.h.bf16 %v3096_v8 }
  0xcb   : > { %v3102_v62 = vunpack.i.l.bf16 %v3101_v21  ;;  %v3103_v42 = vunpack.i.h.bf16 %v3101_v21 }
  0xcc   : > { %v920_v1 = vsel %vm899_vm4, %v3671_v38, %v3097_v49  ;;  %2730 = vmatprep.mubr.msk.bf16.mxu1 %vm1024_vm6, %v3964_v51  ;;  %2767 = vmatmul.mubr.msk.bf16.gmra.mrb[16].mxu0 %vm1024_vm6, %v3964_v51  ;;  %v921_v25 = vsel %vm899_vm4, %v3688_v55, %v3098_v2 }
  0xcd   : > { %v952_v28 = vsel %vm931_vm5, %v920_v1, %v3102_v62  ;;  %v953_v30 = vsel %vm931_vm5, %v921_v25, %v3103_v42 }
  0xce   : > { %v3974_v61 = vpack.c.bf16 %v952_v28, %v951_v19  ;;  %v3106_v3 = vpop.permute.xlu0 %3105  ;;  %v3111_v27 = vpop.permute.xlu1 %3110 }
  0xcf   : > { %v3108_v58 = vunpack.i.h.bf16 %v3106_v3  ;;  %v3107_v38 = vunpack.i.l.bf16 %v3106_v3  ;;  %v3112_v12 = vunpack.i.l.bf16 %v3111_v27  ;;  %v3113_v13 = vunpack.i.h.bf16 %v3111_v27 }
  0xd0   : > { %2731 = vmatmul.mubr.msk.bf16.gmra.mrb[16].mxu1 %vm1024_vm6, %v3974_v61  ;;  %2770 = vmatprep.mubr.msk.bf16.mxu0 %vm1024_vm6, %v3974_v61 }
  0xd1   : > { %v922_v44 = vsel %vm899_vm4, %v3682_v52, %v3107_v38  ;;  %v923_v55 = vsel %vm899_vm4, %v3713_v46, %v3108_v58 }
  0xd2   : > { %v954_v40 = vsel %vm931_vm5, %v922_v44, %v3112_v12  ;;  %v3116_v34 = vpop.permute.xlu0 %3115  ;;  %v955_v52 = vsel %vm931_vm5, %v923_v55, %v3113_v13 }
  0xd3   : > { %v3988_v43 = vpack.c.bf16 %v954_v40, %v953_v30  ;;  %v3118_v23 = vunpack.i.h.bf16 %v3116_v34  ;;  %v3117_v22 = vunpack.i.l.bf16 %v3116_v34  ;;  %v3121_v41 = vpop.permute.xlu1 %3120 }
  0xd4   : > { %v3122_v33 = vunpack.i.l.bf16 %v3121_v41  ;;  %v3123_v20 = vunpack.i.h.bf16 %v3121_v41 }
  0xd5   : > { %v924_v39 = vsel %vm899_vm4, %v3722_v63, %v3117_v22  ;;  %2734 = vmatprep.mubr.msk.bf16.mxu1 %vm1024_vm6, %v3988_v43  ;;  %2771 = vmatmul.mubr.msk.bf16.gmra.mrb[20].mxu0 %vm1024_vm6, %v3988_v43  ;;  %v925_v4 = vsel %vm899_vm4, %v3747_v56, %v3118_v23 }
  0xd6   : > { %v956_v46 = vsel %vm931_vm5, %v924_v39, %v3122_v33  ;;  %v3126_v50 = vpop.permute.xlu0 %3125  ;;  %v957_v62 = vsel %vm931_vm5, %v925_v4, %v3123_v20 }
  0xd7   : > { %v4000_v8 = vpack.c.bf16 %v956_v46, %v955_v52  ;;  %v3128_v17 = vunpack.i.h.bf16 %v3126_v50  ;;  %v3127_v49 = vunpack.i.l.bf16 %v3126_v50  ;;  %v3131_v63 = vpop.permute.xlu1 %3130 }
  0xd8   : > { %v3132_v21 = vunpack.i.l.bf16 %v3131_v63  ;;  %v3133_v1 = vunpack.i.h.bf16 %v3131_v63  ;;  %v3163_v63 = vld [vmem:[%s3450_s17 + $0x28] sm:$0xff] }
  0xd9   : > { %v926_v2 = vsel %vm899_vm4, %v3744_v16, %v3127_v49  ;;  %2735 = vmatmul.mubr.msk.bf16.gmra.mrb[20].mxu1 %vm1024_vm6, %v4000_v8  ;;  %2774 = vmatprep.mubr.msk.bf16.mxu0 %vm1024_vm6, %v4000_v8  ;;  %v927_v28 = vsel %vm899_vm4, %v3774_v54, %v3128_v17 }
  0xda   : > { %v958_v56 = vsel %vm931_vm5, %v926_v2, %v3132_v21  ;;  %v3136_v19 = vpop.permute.xlu0 %3135  ;;  %v959_v38 = vsel %vm931_vm5, %v927_v28, %v3133_v1  ;;  %v4869_v2 = vpack.c.bf16 %v3458_v9, %v3455_v6  ;;  %v1833_v6 = vpack.c.bf16 %v3541_v26, %v3538_v24  ;;  %v4881_v28 = vld [vmem:[#allocation23_spill] sm:$0xff] }
  0xdb   : > { %v4012_v42 = vpack.c.bf16 %v958_v56, %v957_v62  ;;  %v3138_v3 = vunpack.i.h.bf16 %v3136_v19  ;;  %v3137_v27 = vunpack.i.l.bf16 %v3136_v19  ;;  %v3141_v16 = vpop.permute.xlu1 %3140  ;;  %v3165_v62 = vld [vmem:[%s3450_s17 + $0x38] sm:$0xff]  ;;  %v3167_v56 = vld [vmem:[%s3450_s17 + $0x48] sm:$0xff]  ;;  %v1834_v9 = vpack.c.bf16 %v3553_v32, %v3550_v31 }
  0xdc   : > { %v3142_v25 = vunpack.i.l.bf16 %v3141_v16  ;;  %v3143_v44 = vunpack.i.h.bf16 %v3141_v16  ;;  %v1836_v24 = vpack.c.bf16 %v3619_v37, %v3616_v36  ;;  %v1837_v26 = vpack.c.bf16 %v3641_v60, %v3638_v59  ;;  %v4870_v31 = vld [vmem:[#allocation12_spill] sm:$0xff]  ;;  %v4873_v37 = vld [vmem:[#allocation15_spill] sm:$0xff] }
  0xdd   : > { %v928_v58 = vsel %vm899_vm4, %v3771_v48, %v3137_v27  ;;  %2738 = vmatprep.mubr.msk.bf16.mxu1 %vm1024_vm6, %v4012_v42  ;;  %2775 = vmatmul.mubr.msk.bf16.gmra.mrb[24].mxu0 %vm1024_vm6, %v4012_v42  ;;  %v929_v54 = vsel %vm899_vm4, %v3788_v47, %v3138_v3  ;;  %v1838_v32 = vpack.c.bf16 %v4870_v31, %v3650_v5  ;;  %v4874_v59 = vld [vmem:[#allocation16_spill] sm:$0xff]  ;;  %v4875_v5 = vld [vmem:[#allocation17_spill] sm:$0xff] }
  0xde   : > { %v960_v12 = vsel %vm931_vm5, %v928_v58, %v3142_v25  ;;  %v961_v41 = vsel %vm931_vm5, %v929_v54, %v3143_v44  ;;  %v1840_v60 = vpack.c.bf16 %v4874_v59, %v4873_v37 }
  0xdf   : > { %v4024_v30 = vpack.c.bf16 %v960_v12, %v959_v38  ;;  %v3146_v13 = vpop.permute.xlu0 %3145  ;;  %v3151_v40 = vpop.permute.xlu1 %3150 }
  0xe0   : > { %v3148_v34 = vunpack.i.h.bf16 %v3146_v13  ;;  %v3147_v48 = vunpack.i.l.bf16 %v3146_v13  ;;  %v3153_v55 = vunpack.i.h.bf16 %v3151_v40  ;;  %v3152_v23 = vunpack.i.l.bf16 %v3151_v40 }
  0xe1   : > { %2739 = vmatmul.mubr.msk.bf16.gmra.mrb[24].mxu1 %vm1024_vm6, %v4024_v30  ;;  %2778 = vmatprep.mubr.msk.bf16.mxu0 %vm1024_vm6, %v4024_v30 }
  0xe2   : > { %v930_v47 = vsel %vm899_vm4, %v3782_v10, %v3147_v48  ;;  %v1006_v22 = vsel %vm899_vm4, %v3813_v57, %v3148_v34  ;;  %v3160_v10 = vld [vmem:[%s3450_s17] sm:$0xff]  ;;  %v3161_v57 = vld [vmem:[%s3450_s17 + $0x8] sm:$0xff] }
  0xe3   : > { %v962_v33 = vsel %vm931_vm5, %v930_v47, %v3152_v23  ;;  %v992_v39 = vpop.permute.xlu0 %991  ;;  %v1003_v52 = vpop.permute.xlu1 %1002  ;;  %v1008_v50 = vsel %vm931_vm5, %v1006_v22, %v3153_v55  ;;  %v1828_v17 = vpack.c.bf16 %v3161_v57, %v3160_v10 }
  0xe4   : > { %v978_v20 = vpack.c.bf16 %v962_v33, %v961_v41  ;;  %v1007_v46 = vsel %vm899_vm4, %v3822_v45, %v992_v39  ;;  %v3162_v45 = vld [vmem:[%s3450_s17 + $0x20] sm:$0xff] }
  0xe5   : > { %v1009_v4 = vsel %vm931_vm5, %v1007_v46, %v1003_v52  ;;  %v1830_v21 = vpack.c.bf16 %v3163_v63, %v3162_v45 }
  0xe6   : > { %2742 = vmatprep.mubr.msk.bf16.mxu1 %vm1024_vm6, %v978_v20  ;;  %2779 = vmatmul.mubr.msk.bf16.gmra.mrb[28].mxu0 %vm1024_vm6, %v978_v20  ;;  %v1010_v49 = vpack.c.bf16 %v1009_v4, %v1008_v50 }
  0xe7   : > { %2786 = vmatprep.mubr.msk.bf16.mxu0 %vm1024_vm6, %v3878_v11  ;;  %v3164_v11 = vld [vmem:[%s3450_s17 + $0x30] sm:$0xff] }
  0xe8   : > { %v1831_v1 = vpack.c.bf16 %v3165_v62, %v3164_v11 }
  0xe9   : > { %2743 = vmatmul.mubr.msk.bf16.gmra.mrb[28].mxu1 %vm1024_vm6, %v1010_v49 }
  0xea   : > { %2820 = vmatprep.mubr.msk.bf16.mxu1 %vm899_vm4, %v1828_v17 }
  0xee   : > { %2787 = vmatmul.mubr.msk.bf16.vlgmr.msra.gmra.mrb[0].mxu0 %vm1024_vm6, %v3892_v18  ;;  %v3166_v18 = vld [vmem:[%s3450_s17 + $0x40] sm:$0xff]  ;;  %s4171_s17 = sand.u32 1, %s3322_s22  }
  0xef   : > { %2790 = vmatprep.mubr.msk.bf16.mxu0 %vm1024_vm6, %v3904_v35  ;;  %v1832_v19 = vpack.c.bf16 %v3167_v56, %v3166_v18  ;;  %v1835_v35 = vpack.c.bf16 %v3597_v7, %v3592_v0  ;;  %v4871_v0 = vld [vmem:[#allocation13_spill] sm:$0xff]  ;;  %v4872_v7 = vld [vmem:[#allocation14_spill] sm:$0xff]  ;;  %s2542_s8 = sshll.u32 %s4171_s17, 8  ;;  %s2262_s19 = scalar_lea.sflag [#allocation3], %s4171_s17 }
  0xf0   : > { %v1839_v36 = vpack.c.bf16 %v4872_v7, %v4871_v0  ;;  %s4182_s11 = scalar_lea.vmem [#allocation2], %s2542_s8  ;;  %s4188_s12 = scalar_lea.vmem [#allocation6], %s2542_s8 }
  0xf1   : > { %2821 = vmatmul.mubr.msk.bf16.vlgmr.msra.gmra.mrb[32].mxu1 %vm899_vm4, %v4869_v2  ;;  %s2291_s14 = sshll.u32 %s4182_s11, 4  ;;  %s3343_s8 = smov [#allocation2]   ;;  %s4628_s14 = int_to_ptr.vmem [resolvable:$true] %s2291_s14 }
  0xf2   : > { %2824 = vmatprep.mubr.msk.bf16.mxu1 %vm899_vm4, %v1830_v21  ;;  %s3168_s30 = scalar_lea.vmem %s4628_s14, 4096 }
  0xf3   : > { %p3169_p12 = scmp.ne.s32.totalorder %s4628_s14, %s3168_s30 }
  0xf5   : > { %p3170_p13 = pnand %p3169_p12, %p3425_p4 }
  0xf6   : > { %2791 = vmatmul.mubr.msk.bf16.gmra.mrb[4].mxu0 %vm1024_vm6, %v3916_v15  ;;  %v4876_v15 = vld [vmem:[#allocation18_spill] sm:$0xff] }
  0xf7   : > { %2794 = vmatprep.mubr.msk.bf16.mxu0 %vm1024_vm6, %v3928_v53  ;;  %v1841_v53 = vpack.c.bf16 %v4876_v15, %v4875_v5  ;;  %p3171_p0 = pneg %p3170_p13 }
  0xf9   : > { %2825 = vmatmul.mubr.msk.bf16.gmra.mrb[36].mxu1 %vm899_vm4, %v1831_v1 }
  0xfa   : > { %2828 = vmatprep.mubr.msk.bf16.mxu1 %vm899_vm4, %v1832_v19 }
  0xfe   : > { %2795 = vmatmul.mubr.msk.bf16.gmra.mrb[8].mxu0 %vm1024_vm6, %v3940_v14  ;;  %v4877_v14 = vld [vmem:[#allocation19_spill] sm:$0xff] }
  0xff   : > { %2798 = vmatprep.mubr.msk.bf16.mxu0 %vm1024_vm6, %v3952_v29  ;;  %v4878_v29 = vld [vmem:[#allocation20_spill] sm:$0xff] }
 0x101   : > { %2829 = vmatmul.mubr.msk.bf16.gmra.mrb[40].mxu1 %vm899_vm4, %v1833_v6 }
 0x102   : > { %2832 = vmatprep.mubr.msk.bf16.mxu1 %vm899_vm4, %v1834_v9 }
 0x106   : > { %2799 = vmatmul.mubr.msk.bf16.gmra.mrb[12].mxu0 %vm1024_vm6, %v3964_v51  ;;  %v1842_v51 = vpack.c.bf16 %v4878_v29, %v4877_v14 }
 0x107   : > { %2802 = vmatprep.mubr.msk.bf16.mxu0 %vm1024_vm6, %v3974_v61  ;;  %v4879_v61 = vld [vmem:[#allocation21_spill] sm:$0xff] }
 0x109   : > { %2833 = vmatmul.mubr.msk.bf16.gmra.mrb[44].mxu1 %vm899_vm4, %v1835_v35 }
 0x10a   : > { %2836 = vmatprep.mubr.msk.bf16.mxu1 %vm899_vm4, %v1836_v24 }
 0x10e   : > { %2803 = vmatmul.mubr.msk.bf16.gmra.mrb[16].mxu0 %vm1024_vm6, %v3988_v43  ;;  %v4880_v43 = vld [vmem:[#allocation22_spill] sm:$0xff] }
 0x10f   : > { %2806 = vmatprep.mubr.msk.bf16.mxu0 %vm1024_vm6, %v4000_v8  ;;  %v1843_v8 = vpack.c.bf16 %v4880_v43, %v4879_v61 }
 0x111   : > { %2837 = vmatmul.mubr.msk.bf16.gmra.mrb[48].mxu1 %vm899_vm4, %v1837_v26 }
 0x112   : > { %2840 = vmatprep.mubr.msk.bf16.mxu1 %vm899_vm4, %v1838_v32 }
 0x116   : > { %2807 = vmatmul.mubr.msk.bf16.gmra.mrb[20].mxu0 %vm1024_vm6, %v4012_v42 }
 0x117   : > { %2810 = vmatprep.mubr.msk.bf16.mxu0 %vm1024_vm6, %v4024_v30 }
 0x119   : > { %2841 = vmatmul.mubr.msk.bf16.gmra.mrb[52].mxu1 %vm899_vm4, %v1839_v36 }
 0x11a   : > { %2844 = vmatprep.mubr.msk.bf16.mxu1 %vm899_vm4, %v1840_v60 }
 0x11e   : > { %2811 = vmatmul.mubr.msk.bf16.gmra.mrb[24].mxu0 %vm1024_vm6, %v978_v20 }
 0x11f   : > { %2814 = vmatprep.mubr.msk.bf16.mxu0 %vm1024_vm6, %v1010_v49 }
 0x121   : > { %2845 = vmatmul.mubr.msk.bf16.gmra.mrb[56].mxu1 %vm899_vm4, %v1841_v53 }
 0x122   : > { %2848 = vmatprep.mubr.msk.bf16.mxu1 %vm899_vm4, %v1842_v51 }
 0x126   : > { %2815 = vmatmul.mubr.msk.bf16.gmra.mrb[28].mxu0 %vm1024_vm6, %v4881_v28 }
 0x129   : > { %2849 = vmatmul.mubr.msk.bf16.gmra.mrb[60].mxu1 %vm899_vm4, %v1843_v8 }
 0x183   : > { %v2716_v42 = vpop.f32.mrb[0].mxu1 }
 0x184   : > { %v1111_v3 = vpop.f32.mrb[1].mxu1 }
 0x185   : > { %v2717_v27 = vpop.f32.mrb[2].mxu1 }
 0x186   : > { %v1114_v16 = vpop.f32.mrb[3].mxu1 }
 0x18b   : > { %v4122_v25 = vpop.f32.mrb[4].mxu1 }
 0x18c   : > { %v4124_v58 = vpop.f32.mrb[5].mxu1 }
 0x18d   : > { %v4126_v38 = vpop.f32.mrb[6].mxu1 }
 0x18e   : > { %v4128_v12 = vpop.f32.mrb[7].mxu1 }
 0x193   : > { %v4130_v54 = vpop.f32.mrb[8].mxu1 }
 0x194   : > { %v4132_v44 = vpop.f32.mrb[9].mxu1 }
 0x195   : > { %v4134_v30 = vpop.f32.mrb[10].mxu1 }
 0x196   : > { %v4136_v13 = vpop.f32.mrb[11].mxu1 }
 0x19b   : > { %v4138_v40 = vpop.f32.mrb[12].mxu1 }
 0x19c   : > { %v4140_v34 = vpop.f32.mrb[13].mxu1 }
 0x19d   : > { %v4142_v48 = vpop.f32.mrb[14].mxu1 }
 0x19e   : > { %v4144_v55 = vpop.f32.mrb[15].mxu1 }
 0x1a3   : > { %v4146_v23 = vpop.f32.mrb[16].mxu1 }
 0x1a4   : > { %v4148_v47 = vpop.f32.mrb[17].mxu1 }
 0x1a5   : > { %v4150_v22 = vpop.f32.mrb[18].mxu1 }
 0x1a6   : > { %v4152_v41 = vpop.f32.mrb[19].mxu1 }
 0x1ac   : > { %v4154_v33 = vpop.f32.mrb[20].mxu1 }
 0x1ad   : > { %v4156_v39 = vpop.f32.mrb[21].mxu1 }
 0x1ae   : > { %v4158_v52 = vpop.f32.mrb[22].mxu1 }
 0x1af   : > { %v4160_v20 = vpop.f32.mrb[23].mxu1 }
 0x1b4   : > { %v4162_v46 = vpop.f32.mrb[24].mxu1 }
 0x1b5   : > { %v4164_v50 = vpop.f32.mrb[25].mxu1 }
 0x1b6   : > { %v4166_v4 = vpop.f32.mrb[26].mxu1 }
 0x1b7   : > { %v4168_v10 = vpop.f32.mrb[27].mxu1 }
 0x1bc   : > { %v4173_v57 = vpop.f32.mrb[28].mxu1 }
 0x1bd   : > { %v4175_v17 = vpop.f32.mrb[29].mxu1 }
 0x1be   : > { %v4177_v49 = vpop.f32.mrb[30].mxu1 }
 0x1bf   : > { %v4180_v45 = vpop.f32.mrb[31].mxu1 }
 0x1c1   : > { %v2788_v63 = vpop.f32.mrb[0].mxu0 }
 0x1c2   : > { %v2852_v21 = vadd.f32 %v2788_v63, %v2716_v42  ;;  %v1464_v2 = vpop.f32.mrb[1].mxu0 }
 0x1c3   : > { %v2853_v11 = vadd.f32 %v1464_v2, %v1111_v3  ;;  %v2789_v62 = vpop.f32.mrb[2].mxu0 }
 0x1c4   : > { %1625 = vst.msk [vmem:[%s4182_s11 + $0x10] sm:$0xff] %vm931_vm5, %v2852_v21  ;;  %v1726_v1 = vmul.f32 %v2852_v21, %v2852_v21  ;;  %v2854_v18 = vadd.f32 %v2789_v62, %v2717_v27  ;;  %v1467_v56 = vpop.f32.mrb[3].mxu0  ;;  %v2822_v19 = vpop.f32.mrb[32].mxu1  ;;  %v1658_v24 = vsel %vm931_vm5, %v2852_v21, 0.0 }
 0x1c5   : > { %1623 = vst.msk [vmem:[%s4182_s11] sm:$0xff] %vm931_vm5, %v2853_v11  ;;  %v1724_v6 = vmul.f32 %v2853_v11, %v2853_v11  ;;  %v2855_v9 = vadd.f32 %v1467_v56, %v1114_v16  ;;  %2059 = vst.msk [vmem:[%s4188_s12 + $0x10] sm:$0xff] %vm931_vm5, %v2822_v19  ;;  %v1930_v35 = vpop.f32.mrb[33].mxu1  ;;  %v1655_v26 = vsel %vm931_vm5, %v2853_v11, 0.0  ;;  %v2092_v37 = vsel %vm931_vm5, %v2822_v19, 0.0 }
 0x1c6   : > { %1626 = vst.msk [vmem:[%s4182_s11 + $0x18] sm:$0xff] %vm931_vm5, %v2854_v18  ;;  %v1727_v31 = vmul.f32 %v2854_v18, %v2854_v18  ;;  %2057 = vst.msk [vmem:[%s4188_s12] sm:$0xff] %vm931_vm5, %v1930_v35  ;;  %v2823_v32 = vpop.f32.mrb[34].mxu1  ;;  %v1759_v0 = vsel %vm931_vm5, %v1726_v1, 0.0  ;;  %v1660_v5 = vsel %vm931_vm5, %v2854_v18, 0.0  ;;  %v2160_v53 = vmul.f32 %v2822_v19, %v2822_v19 }
 0x1c7   : > { %1624 = vst.msk [vmem:[%s4182_s11 + $0x8] sm:$0xff] %vm931_vm5, %v2855_v9  ;;  %v1656_v7 = vsel %vm931_vm5, %v2855_v9, 0.0  ;;  %v1725_v36 = vmul.f32 %v2855_v9, %v2855_v9  ;;  %2060 = vst.msk [vmem:[%s4188_s12 + $0x18] sm:$0xff] %vm931_vm5, %v2823_v32  ;;  %v1933_v59 = vpop.f32.mrb[35].mxu1  ;;  %v1756_v60 = vsel %vm931_vm5, %v1724_v6, 0.0  ;;  %v2089_v29 = vsel %vm931_vm5, %v1930_v35, 0.0 }
 0x1c8   : > { %v1657_v15 = vadd.f32 %v1656_v7, %v1655_v26  ;;  %2058 = vst.msk [vmem:[%s4188_s12 + $0x8] sm:$0xff] %vm931_vm5, %v1933_v59  ;;  %v2158_v51 = vmul.f32 %v1930_v35, %v1930_v35  ;;  %v2090_v61 = vsel %vm931_vm5, %v1933_v59, 0.0  ;;  %v1761_v8 = vsel %vm931_vm5, %v1727_v31, 0.0 }
 0x1c9   : > { %v1757_v14 = vsel %vm931_vm5, %v1725_v36, 0.0  ;;  %v2792_v43 = vpop.f32.mrb[4].mxu0  ;;  %v2091_v3 = vadd.f32 %v2090_v61, %v2089_v29  ;;  %v2161_v16 = vmul.f32 %v2823_v32, %v2823_v32  ;;  %v2159_v63 = vmul.f32 %v1933_v59, %v1933_v59 }
 0x1ca   : > { %v1659_v28 = vadd.f32 %v1658_v24, %v1657_v15  ;;  %v1758_v42 = vadd.f32 %v1757_v14, %v1756_v60  ;;  %v1480_v27 = vpop.f32.mrb[5].mxu0  ;;  %v2856_v21 = vadd.f32 %v2792_v43, %v4122_v25  ;;  %v2190_v9 = vsel %vm931_vm5, %v2158_v51, 0.0 }
 0x1cb   : > { %v2857_v2 = vadd.f32 %v1480_v27, %v4124_v58  ;;  %v2793_v11 = vpop.f32.mrb[6].mxu0  ;;  %v2093_v1 = vadd.f32 %v2092_v37, %v2091_v3  ;;  %v2191_v35 = vsel %vm931_vm5, %v2159_v63, 0.0  ;;  %v2193_v36 = vsel %vm931_vm5, %v2160_v53, 0.0 }
 0x1cc   : > { %v1760_v62 = vadd.f32 %v1759_v0, %v1758_v42  ;;  %v1661_v18 = vadd.f32 %v1660_v5, %v1659_v28  ;;  %v2858_v56 = vadd.f32 %v2793_v11, %v4126_v38  ;;  %v1483_v19 = vpop.f32.mrb[7].mxu0  ;;  %v2826_v6 = vpop.f32.mrb[36].mxu1  ;;  %1629 = vst.msk [vmem:[%s4182_s11 + $0x30] sm:$0xff] %vm931_vm5, %v2856_v21  ;;  %v1730_v24 = vmul.f32 %v2856_v21, %v2856_v21 }
 0x1cd   : > { %1627 = vst.msk [vmem:[%s4182_s11 + $0x20] sm:$0xff] %vm931_vm5, %v2857_v2  ;;  %v1662_v25 = vsel %vm931_vm5, %v2857_v2, 0.0  ;;  %2063 = vst.msk [vmem:[%s4188_s12 + $0x30] sm:$0xff] %vm931_vm5, %v2826_v6  ;;  %v1946_v58 = vpop.f32.mrb[37].mxu1  ;;  %v2192_v26 = vadd.f32 %v2191_v35, %v2190_v9  ;;  %v1728_v31 = vmul.f32 %v2857_v2, %v2857_v2  ;;  %v2094_v37 = vsel %vm931_vm5, %v2823_v32, 0.0 }
 0x1ce   : > { %v1663_v38 = vadd.f32 %v1662_v25, %v1661_v18  ;;  %v1762_v0 = vadd.f32 %v1761_v8, %v1760_v62  ;;  %1630 = vst.msk [vmem:[%s4182_s11 + $0x38] sm:$0xff] %vm931_vm5, %v2858_v56  ;;  %2061 = vst.msk [vmem:[%s4188_s12 + $0x20] sm:$0xff] %vm931_vm5, %v1946_v58  ;;  %v4229_v7 = vpop.f32.mrb[38].mxu1  ;;  %v2195_v59 = vsel %vm931_vm5, %v2161_v16, 0.0  ;;  %v2859_v60 = vadd.f32 %v1483_v19, %v4128_v12 }
 0x1cf   : > { %2064 = vst.msk [vmem:[%s4188_s12 + $0x38] sm:$0xff] %vm931_vm5, %v4229_v7  ;;  %v1949_v5 = vpop.f32.mrb[39].mxu1  ;;  %v2194_v15 = vadd.f32 %v2193_v36, %v2192_v26  ;;  %v1666_v14 = vsel %vm931_vm5, %v2856_v21, 0.0  ;;  %v1767_v29 = vsel %vm931_vm5, %v1730_v24, 0.0  ;;  %v1763_v51 = vsel %vm931_vm5, %v1728_v31, 0.0 }
 0x1d0   : > { %2062 = vst.msk [vmem:[%s4188_s12 + $0x28] sm:$0xff] %vm931_vm5, %v1949_v5  ;;  %v1764_v53 = vadd.f32 %v1763_v51, %v1762_v0  ;;  %v1668_v32 = vsel %vm931_vm5, %v2858_v56, 0.0  ;;  %1628 = vst.msk [vmem:[%s4182_s11 + $0x28] sm:$0xff] %vm931_vm5, %v2859_v60  ;;  %v1664_v12 = vsel %vm931_vm5, %v2859_v60, 0.0  ;;  %v1729_v61 = vmul.f32 %v2859_v60, %v2859_v60 }
 0x1d1   : > { %v2796_v43 = vpop.f32.mrb[8].mxu0  ;;  %v1731_v8 = vmul.f32 %v2858_v56, %v2858_v56  ;;  %v1665_v28 = vadd.f32 %v1664_v12, %v1663_v38  ;;  %v2095_v42 = vadd.f32 %v2094_v37, %v2093_v1  ;;  %v2096_v3 = vsel %vm931_vm5, %v1946_v58, 0.0 }
 0x1d2   : > { %v1496_v27 = vpop.f32.mrb[9].mxu0  ;;  %v1765_v16 = vsel %vm931_vm5, %v1729_v61, 0.0  ;;  %v2100_v63 = vsel %vm931_vm5, %v2826_v6, 0.0  ;;  %v2162_v21 = vmul.f32 %v1946_v58, %v1946_v58  ;;  %v2196_v2 = vadd.f32 %v2195_v59, %v2194_v15 }
 0x1d3   : > { %v2797_v11 = vpop.f32.mrb[10].mxu0  ;;  %v1667_v62 = vadd.f32 %v1666_v14, %v1665_v28  ;;  %v1766_v18 = vadd.f32 %v1765_v16, %v1764_v53  ;;  %v2164_v19 = vmul.f32 %v2826_v6, %v2826_v6  ;;  %v2097_v9 = vadd.f32 %v2096_v3, %v2095_v42 }
 0x1d4   : > { %v1499_v35 = vpop.f32.mrb[11].mxu0  ;;  %v4250_v56 = vpop.f32.mrb[40].mxu1  ;;  %v2197_v1 = vsel %vm931_vm5, %v2162_v21, 0.0  ;;  %v2098_v24 = vsel %vm931_vm5, %v1949_v5, 0.0  ;;  %v2163_v25 = vmul.f32 %v1949_v5, %v1949_v5  ;;  %v2860_v26 = vadd.f32 %v2796_v43, %v4130_v54 }
 0x1d5   : > { %2067 = vst.msk [vmem:[%s4188_s12 + $0x50] sm:$0xff] %vm931_vm5, %v4250_v56  ;;  %v1962_v58 = vpop.f32.mrb[41].mxu1  ;;  %v1769_v38 = vsel %vm931_vm5, %v1731_v8, 0.0  ;;  %v1768_v6 = vadd.f32 %v1767_v29, %v1766_v18  ;;  %v2198_v31 = vadd.f32 %v2197_v1, %v2196_v2  ;;  %v2099_v0 = vadd.f32 %v2098_v24, %v2097_v9 }
 0x1d6   : > { %2065 = vst.msk [vmem:[%s4188_s12 + $0x40] sm:$0xff] %vm931_vm5, %v1962_v58  ;;  %v4261_v36 = vpop.f32.mrb[42].mxu1  ;;  %v2165_v37 = vmul.f32 %v4229_v7, %v4229_v7  ;;  %v2199_v54 = vsel %vm931_vm5, %v2163_v25, 0.0  ;;  %1633 = vst.msk [vmem:[%s4182_s11 + $0x50] sm:$0xff] %vm931_vm5, %v2860_v26  ;;  %v1734_v59 = vmul.f32 %v2860_v26, %v2860_v26  ;;  %v2861_v60 = vadd.f32 %v1496_v27, %v4132_v44 }
 0x1d7   : > { %2068 = vst.msk [vmem:[%s4188_s12 + $0x58] sm:$0xff] %vm931_vm5, %v4261_v36  ;;  %v1965_v5 = vpop.f32.mrb[43].mxu1  ;;  %v2101_v15 = vadd.f32 %v2100_v63, %v2099_v0  ;;  %v2200_v14 = vadd.f32 %v2199_v54, %v2198_v31  ;;  %v1669_v29 = vadd.f32 %v1668_v32, %v1667_v62  ;;  %v1770_v51 = vadd.f32 %v1769_v38, %v1768_v6 }
 0x1d8   : > { %2066 = vst.msk [vmem:[%s4188_s12 + $0x48] sm:$0xff] %vm931_vm5, %v1965_v5  ;;  %v2201_v53 = vsel %vm931_vm5, %v2164_v19, 0.0  ;;  %1631 = vst.msk [vmem:[%s4182_s11 + $0x40] sm:$0xff] %vm931_vm5, %v2861_v60  ;;  %v1670_v12 = vsel %vm931_vm5, %v2861_v60, 0.0  ;;  %v1732_v61 = vmul.f32 %v2861_v60, %v2861_v60  ;;  %v2862_v44 = vadd.f32 %v2797_v11, %v4134_v30 }
 0x1d9   : > { %v2800_v43 = vpop.f32.mrb[12].mxu0  ;;  %v2102_v8 = vsel %vm931_vm5, %v4229_v7, 0.0  ;;  %v2202_v28 = vadd.f32 %v2201_v53, %v2200_v14  ;;  %v1671_v32 = vadd.f32 %v1670_v12, %v1669_v29  ;;  %v2863_v42 = vadd.f32 %v1499_v35, %v4136_v13 }
 0x1da   : > { %v1512_v3 = vpop.f32.mrb[13].mxu0  ;;  %v2203_v27 = vsel %vm931_vm5, %v2165_v37, 0.0  ;;  %v1674_v16 = vsel %vm931_vm5, %v2860_v26, 0.0  ;;  %v1775_v63 = vsel %vm931_vm5, %v1734_v59, 0.0  ;;  %v1771_v21 = vsel %vm931_vm5, %v1732_v61, 0.0  ;;  %1634 = vst.msk [vmem:[%s4182_s11 + $0x58] sm:$0xff] %vm931_vm5, %v2862_v44 }
 0x1db   : > { %v2801_v30 = vpop.f32.mrb[14].mxu0  ;;  %v1772_v2 = vadd.f32 %v1771_v21, %v1770_v51  ;;  %1632 = vst.msk [vmem:[%s4182_s11 + $0x48] sm:$0xff] %vm931_vm5, %v2863_v42  ;;  %v1672_v7 = vsel %vm931_vm5, %v2863_v42, 0.0  ;;  %v1733_v13 = vmul.f32 %v2863_v42, %v2863_v42  ;;  %v2103_v11 = vadd.f32 %v2102_v8, %v2101_v15 }
 0x1dc   : > { %v1515_v62 = vpop.f32.mrb[15].mxu0  ;;  %v4291_v18 = vpop.f32.mrb[44].mxu1  ;;  %v1735_v19 = vmul.f32 %v2862_v44, %v2862_v44  ;;  %v1673_v9 = vadd.f32 %v1672_v7, %v1671_v32  ;;  %v2108_v35 = vsel %vm931_vm5, %v4250_v56, 0.0  ;;  %v2104_v1 = vsel %vm931_vm5, %v1962_v58, 0.0 }
 0x1dd   : > { %2071 = vst.msk [vmem:[%s4188_s12 + $0x70] sm:$0xff] %vm931_vm5, %v4291_v18  ;;  %v4299_v24 = vpop.f32.mrb[45].mxu1  ;;  %v1773_v25 = vsel %vm931_vm5, %v1733_v13, 0.0  ;;  %v2105_v26 = vadd.f32 %v2104_v1, %v2103_v11  ;;  %v2166_v38 = vmul.f32 %v1962_v58, %v1962_v58  ;;  %v2204_v6 = vadd.f32 %v2203_v27, %v2202_v28 }
 0x1de   : > { %2069 = vst.msk [vmem:[%s4188_s12 + $0x60] sm:$0xff] %vm931_vm5, %v4299_v24  ;;  %v4305_v31 = vpop.f32.mrb[46].mxu1  ;;  %v1676_v0 = vsel %vm931_vm5, %v2862_v44, 0.0  ;;  %v1675_v37 = vadd.f32 %v1674_v16, %v1673_v9  ;;  %v1774_v54 = vadd.f32 %v1773_v25, %v1772_v2  ;;  %v2168_v59 = vmul.f32 %v4250_v56, %v4250_v56 }
 0x1df   : > { %2072 = vst.msk [vmem:[%s4188_s12 + $0x78] sm:$0xff] %vm931_vm5, %v4305_v31  ;;  %v4313_v60 = vpop.f32.mrb[47].mxu1  ;;  %v2205_v58 = vsel %vm931_vm5, %v2166_v38, 0.0  ;;  %v2106_v15 = vsel %vm931_vm5, %v1965_v5, 0.0  ;;  %v2167_v14 = vmul.f32 %v1965_v5, %v1965_v5  ;;  %v2864_v29 = vadd.f32 %v2800_v43, %v4138_v40 }
 0x1e0   : > { %2070 = vst.msk [vmem:[%s4188_s12 + $0x68] sm:$0xff] %vm931_vm5, %v4313_v60  ;;  %v1777_v51 = vsel %vm931_vm5, %v1735_v19, 0.0  ;;  %v1776_v53 = vadd.f32 %v1775_v63, %v1774_v54  ;;  %v2206_v56 = vadd.f32 %v2205_v58, %v2204_v6  ;;  %v2107_v12 = vadd.f32 %v2106_v15, %v2105_v26 }
 0x1e1   : > { %v2804_v61 = vpop.f32.mrb[16].mxu0  ;;  %v2169_v44 = vmul.f32 %v4261_v36, %v4261_v36  ;;  %v2207_v8 = vsel %vm931_vm5, %v2167_v14, 0.0  ;;  %1637 = vst.msk [vmem:[%s4182_s11 + $0x70] sm:$0xff] %vm931_vm5, %v2864_v29  ;;  %v1738_v5 = vmul.f32 %v2864_v29, %v2864_v29  ;;  %v2865_v40 = vadd.f32 %v1512_v3, %v4140_v34 }
 0x1e2   : > { %v4328_v43 = vpop.f32.mrb[17].mxu0  ;;  %v2109_v28 = vadd.f32 %v2108_v35, %v2107_v12  ;;  %v2208_v32 = vadd.f32 %v2207_v8, %v2206_v56  ;;  %v1677_v42 = vadd.f32 %v1676_v0, %v1675_v37  ;;  %v1778_v27 = vadd.f32 %v1777_v51, %v1776_v53 }
 0x1e3   : > { %v4330_v16 = vpop.f32.mrb[18].mxu0  ;;  %v2209_v63 = vsel %vm931_vm5, %v2168_v59, 0.0  ;;  %1635 = vst.msk [vmem:[%s4182_s11 + $0x60] sm:$0xff] %vm931_vm5, %v2865_v40  ;;  %v1678_v21 = vsel %vm931_vm5, %v2865_v40, 0.0  ;;  %v1736_v2 = vmul.f32 %v2865_v40, %v2865_v40  ;;  %v2866_v34 = vadd.f32 %v2801_v30, %v4142_v48 }
 0x1e4   : > { %v4337_v3 = vpop.f32.mrb[19].mxu0  ;;  %v4339_v7 = vpop.f32.mrb[48].mxu1  ;;  %v2110_v13 = vsel %vm931_vm5, %v4261_v36, 0.0  ;;  %v2210_v11 = vadd.f32 %v2209_v63, %v2208_v32  ;;  %v1679_v19 = vadd.f32 %v1678_v21, %v1677_v42  ;;  %v2867_v9 = vadd.f32 %v1515_v62, %v4144_v55 }
 0x1e5   : > { %2075 = vst.msk [vmem:[%s4188_s12 + $0x90] sm:$0xff] %vm931_vm5, %v4339_v7  ;;  %v4347_v35 = vpop.f32.mrb[49].mxu1  ;;  %v2211_v48 = vsel %vm931_vm5, %v2169_v44, 0.0  ;;  %v1682_v30 = vsel %vm931_vm5, %v2864_v29, 0.0  ;;  %v1783_v1 = vsel %vm931_vm5, %v1738_v5, 0.0  ;;  %v1779_v25 = vsel %vm931_vm5, %v1736_v2, 0.0 }
 0x1e6   : > { %1638 = vst.msk [vmem:[%s4182_s11 + $0x78] sm:$0xff] %vm931_vm5, %v2866_v34  ;;  %2073 = vst.msk [vmem:[%s4188_s12 + $0x80] sm:$0xff] %vm931_vm5, %v4347_v35  ;;  %v4358_v55 = vpop.f32.mrb[50].mxu1  ;;  %v1780_v36 = vadd.f32 %v1779_v25, %v1778_v27  ;;  %v1680_v62 = vsel %vm931_vm5, %v2867_v9, 0.0  ;;  %v1737_v26 = vmul.f32 %v2867_v9, %v2867_v9  ;;  %v2111_v38 = vadd.f32 %v2110_v13, %v2109_v28 }
 0x1e7   : > { %1636 = vst.msk [vmem:[%s4182_s11 + $0x68] sm:$0xff] %vm931_vm5, %v2867_v9  ;;  %2076 = vst.msk [vmem:[%s4188_s12 + $0x98] sm:$0xff] %vm931_vm5, %v4358_v55  ;;  %v4366_v6 = vpop.f32.mrb[51].mxu1  ;;  %v1739_v0 = vmul.f32 %v2866_v34, %v2866_v34  ;;  %v1681_v37 = vadd.f32 %v1680_v62, %v1679_v19  ;;  %v2116_v54 = vsel %vm931_vm5, %v4291_v18, 0.0  ;;  %v2112_v59 = vsel %vm931_vm5, %v4299_v24, 0.0 }
 0x1e8   : > { %2074 = vst.msk [vmem:[%s4188_s12 + $0x88] sm:$0xff] %vm931_vm5, %v4366_v6  ;;  %v1781_v58 = vsel %vm931_vm5, %v1737_v26, 0.0  ;;  %v2113_v15 = vadd.f32 %v2112_v59, %v2111_v38  ;;  %v2170_v14 = vmul.f32 %v4299_v24, %v4299_v24  ;;  %v2212_v29 = vadd.f32 %v2211_v48, %v2210_v11 }
 0x1e9   : > { %v4378_v51 = vpop.f32.mrb[20].mxu0  ;;  %v1684_v53 = vsel %vm931_vm5, %v2866_v34, 0.0  ;;  %v1683_v56 = vadd.f32 %v1682_v30, %v1681_v37  ;;  %v1782_v12 = vadd.f32 %v1781_v58, %v1780_v36  ;;  %v2172_v44 = vmul.f32 %v4291_v18, %v4291_v18 }
 0x1ea   : > { %v4383_v8 = vpop.f32.mrb[21].mxu0  ;;  %v2213_v5 = vsel %vm931_vm5, %v2170_v14, 0.0  ;;  %v2114_v40 = vsel %vm931_vm5, %v4313_v60, 0.0  ;;  %v2171_v24 = vmul.f32 %v4313_v60, %v4313_v60  ;;  %v2868_v28 = vadd.f32 %v2804_v61, %v4146_v23 }
 0x1eb   : > { %v4391_v32 = vpop.f32.mrb[22].mxu0  ;;  %v1785_v42 = vsel %vm931_vm5, %v1739_v0, 0.0  ;;  %v1784_v27 = vadd.f32 %v1783_v1, %v1782_v12  ;;  %v2214_v18 = vadd.f32 %v2213_v5, %v2212_v29  ;;  %v2115_v63 = vadd.f32 %v2114_v40, %v2113_v15 }
 0x1ec   : > { %v4394_v21 = vpop.f32.mrb[23].mxu0  ;;  %v4396_v2 = vpop.f32.mrb[52].mxu1  ;;  %v2173_v34 = vmul.f32 %v4305_v31, %v4305_v31  ;;  %v2215_v60 = vsel %vm931_vm5, %v2171_v24, 0.0  ;;  %1641 = vst.msk [vmem:[%s4182_s11 + $0x90] sm:$0xff] %vm931_vm5, %v2868_v28  ;;  %v1742_v23 = vmul.f32 %v2868_v28, %v2868_v28  ;;  %v2869_v61 = vadd.f32 %v4328_v43, %v4148_v47 }
 0x1ed   : > { %2079 = vst.msk [vmem:[%s4188_s12 + $0xb0] sm:$0xff] %vm931_vm5, %v4396_v2  ;;  %v4408_v13 = vpop.f32.mrb[53].mxu1  ;;  %v2117_v11 = vadd.f32 %v2116_v54, %v2115_v63  ;;  %v2216_v19 = vadd.f32 %v2215_v60, %v2214_v18  ;;  %v1685_v9 = vadd.f32 %v1684_v53, %v1683_v56  ;;  %v1786_v48 = vadd.f32 %v1785_v42, %v1784_v27 }
 0x1ee   : > { %2077 = vst.msk [vmem:[%s4188_s12 + $0xa0] sm:$0xff] %vm931_vm5, %v4408_v13  ;;  %v4413_v30 = vpop.f32.mrb[54].mxu1  ;;  %v2217_v1 = vsel %vm931_vm5, %v2172_v44, 0.0  ;;  %1639 = vst.msk [vmem:[%s4182_s11 + $0x80] sm:$0xff] %vm931_vm5, %v2869_v61  ;;  %v1686_v47 = vsel %vm931_vm5, %v2869_v61, 0.0  ;;  %v1740_v43 = vmul.f32 %v2869_v61, %v2869_v61  ;;  %v2870_v25 = vadd.f32 %v4330_v16, %v4150_v22 }
 0x1ef   : > { %2080 = vst.msk [vmem:[%s4188_s12 + $0xb8] sm:$0xff] %vm931_vm5, %v4413_v30  ;;  %v4424_v36 = vpop.f32.mrb[55].mxu1  ;;  %v2118_v62 = vsel %vm931_vm5, %v4305_v31, 0.0  ;;  %v2218_v26 = vadd.f32 %v2217_v1, %v2216_v19  ;;  %v1687_v38 = vadd.f32 %v1686_v47, %v1685_v9  ;;  %v2871_v0 = vadd.f32 %v4337_v3, %v4152_v41 }
 0x1f0   : > { %2078 = vst.msk [vmem:[%s4188_s12 + $0xa8] sm:$0xff] %vm931_vm5, %v4424_v36  ;;  %v2219_v37 = vsel %vm931_vm5, %v2173_v34, 0.0  ;;  %v1690_v22 = vsel %vm931_vm5, %v2868_v28, 0.0  ;;  %v1791_v16 = vsel %vm931_vm5, %v1742_v23, 0.0  ;;  %v1787_v54 = vsel %vm931_vm5, %v1740_v43, 0.0  ;;  %1642 = vst.msk [vmem:[%s4182_s11 + $0x98] sm:$0xff] %vm931_vm5, %v2870_v25 }
 0x1f1   : > { %v4439_v59 = vpop.f32.mrb[24].mxu0  ;;  %v1788_v31 = vadd.f32 %v1787_v54, %v1786_v48  ;;  %1640 = vst.msk [vmem:[%s4182_s11 + $0x88] sm:$0xff] %vm931_vm5, %v2871_v0  ;;  %v1688_v41 = vsel %vm931_vm5, %v2871_v0, 0.0  ;;  %v1741_v3 = vmul.f32 %v2871_v0, %v2871_v0  ;;  %v2119_v58 = vadd.f32 %v2118_v62, %v2117_v11 }
 0x1f2   : > { %v4444_v15 = vpop.f32.mrb[25].mxu0  ;;  %v1743_v14 = vmul.f32 %v2870_v25, %v2870_v25  ;;  %v1689_v29 = vadd.f32 %v1688_v41, %v1687_v38  ;;  %v2124_v53 = vsel %vm931_vm5, %v4339_v7, 0.0  ;;  %v2120_v56 = vsel %vm931_vm5, %v4347_v35, 0.0 }
 0x1f3   : > { %v4450_v12 = vpop.f32.mrb[26].mxu0  ;;  %v1789_v44 = vsel %vm931_vm5, %v1741_v3, 0.0  ;;  %v2121_v5 = vadd.f32 %v2120_v56, %v2119_v58  ;;  %v2174_v40 = vmul.f32 %v4347_v35, %v4347_v35  ;;  %v2220_v24 = vadd.f32 %v2219_v37, %v2218_v26 }
 0x1f4   : > { %v4455_v28 = vpop.f32.mrb[27].mxu0  ;;  %v4457_v42 = vpop.f32.mrb[56].mxu1  ;;  %v1692_v27 = vsel %vm931_vm5, %v2870_v25, 0.0  ;;  %v1691_v18 = vadd.f32 %v1690_v22, %v1689_v29  ;;  %v1790_v63 = vadd.f32 %v1789_v44, %v1788_v31  ;;  %v2176_v34 = vmul.f32 %v4339_v7, %v4339_v7 }
 0x1f5   : > { %2083 = vst.msk [vmem:[%s4188_s12 + $0xd0] sm:$0xff] %vm931_vm5, %v4457_v42  ;;  %v4465_v60 = vpop.f32.mrb[57].mxu1  ;;  %v2221_v35 = vsel %vm931_vm5, %v2174_v40, 0.0  ;;  %v2122_v23 = vsel %vm931_vm5, %v4366_v6, 0.0  ;;  %v2175_v61 = vmul.f32 %v4366_v6, %v4366_v6  ;;  %v2872_v11 = vadd.f32 %v4378_v51, %v4154_v33 }
 0x1f6   : > { %2081 = vst.msk [vmem:[%s4188_s12 + $0xc0] sm:$0xff] %vm931_vm5, %v4465_v60  ;;  %v4477_v7 = vpop.f32.mrb[58].mxu1  ;;  %v1793_v19 = vsel %vm931_vm5, %v1743_v14, 0.0  ;;  %v1792_v9 = vadd.f32 %v1791_v16, %v1790_v63  ;;  %v2222_v48 = vadd.f32 %v2221_v35, %v2220_v24  ;;  %v2123_v1 = vadd.f32 %v2122_v23, %v2121_v5 }
 0x1f7   : > { %2084 = vst.msk [vmem:[%s4188_s12 + $0xd8] sm:$0xff] %vm931_vm5, %v4477_v7  ;;  %v4483_v47 = vpop.f32.mrb[59].mxu1  ;;  %v2177_v6 = vmul.f32 %v4358_v55, %v4358_v55  ;;  %v2223_v33 = vsel %vm931_vm5, %v2175_v61, 0.0  ;;  %1645 = vst.msk [vmem:[%s4182_s11 + $0xb0] sm:$0xff] %vm931_vm5, %v2872_v11  ;;  %v1746_v51 = vmul.f32 %v2872_v11, %v2872_v11  ;;  %v2873_v43 = vadd.f32 %v4383_v8, %v4156_v39 }
 0x1f8   : > { %2082 = vst.msk [vmem:[%s4188_s12 + $0xc8] sm:$0xff] %vm931_vm5, %v4483_v47  ;;  %v2125_v25 = vadd.f32 %v2124_v53, %v2123_v1  ;;  %v2224_v62 = vadd.f32 %v2223_v33, %v2222_v48  ;;  %v1693_v26 = vadd.f32 %v1692_v27, %v1691_v18  ;;  %v1794_v38 = vadd.f32 %v1793_v19, %v1792_v9 }
 0x1f9   : > { %v4495_v0 = vpop.f32.mrb[28].mxu0  ;;  %v2225_v37 = vsel %vm931_vm5, %v2176_v34, 0.0  ;;  %1643 = vst.msk [vmem:[%s4182_s11 + $0xa0] sm:$0xff] %vm931_vm5, %v2873_v43  ;;  %v1694_v22 = vsel %vm931_vm5, %v2873_v43, 0.0  ;;  %v1744_v16 = vmul.f32 %v2873_v43, %v2873_v43  ;;  %v2874_v39 = vadd.f32 %v4391_v32, %v4158_v52 }
 0x1fa   : > { %v4503_v8 = vpop.f32.mrb[29].mxu0  ;;  %v2126_v54 = vsel %vm931_vm5, %v4358_v55, 0.0  ;;  %v2226_v31 = vadd.f32 %v2225_v37, %v2224_v62  ;;  %v1695_v41 = vadd.f32 %v1694_v22, %v1693_v26  ;;  %v2875_v3 = vadd.f32 %v4394_v21, %v4160_v20 }
 0x1fb   : > { %v4509_v58 = vpop.f32.mrb[30].mxu0  ;;  %v2227_v14 = vsel %vm931_vm5, %v2177_v6, 0.0  ;;  %v1698_v29 = vsel %vm931_vm5, %v2872_v11, 0.0  ;;  %v1799_v53 = vsel %vm931_vm5, %v1746_v51, 0.0  ;;  %v1795_v52 = vsel %vm931_vm5, %v1744_v16, 0.0  ;;  %1646 = vst.msk [vmem:[%s4182_s11 + $0xb8] sm:$0xff] %vm931_vm5, %v2874_v39 }
 0x1fc   : > { %v4517_v55 = vpop.f32.mrb[31].mxu0  ;;  %v4519_v32 = vpop.f32.mrb[60].mxu1  ;;  %v1796_v56 = vadd.f32 %v1795_v52, %v1794_v38  ;;  %1644 = vst.msk [vmem:[%s4182_s11 + $0xa8] sm:$0xff] %vm931_vm5, %v2875_v3  ;;  %v1696_v20 = vsel %vm931_vm5, %v2875_v3, 0.0  ;;  %v1745_v21 = vmul.f32 %v2875_v3, %v2875_v3  ;;  %v2127_v44 = vadd.f32 %v2126_v54, %v2125_v25 }
 0x1fd   : > { %2087 = vst.msk [vmem:[%s4188_s12 + $0xf0] sm:$0xff] %vm931_vm5, %v4519_v32  ;;  %v4527_v5 = vpop.f32.mrb[61].mxu1  ;;  %v1747_v40 = vmul.f32 %v2874_v39, %v2874_v39  ;;  %v1697_v24 = vadd.f32 %v1696_v20, %v1695_v41  ;;  %v2180_v27 = vmul.f32 %v4396_v2, %v4396_v2  ;;  %v2128_v18 = vsel %vm931_vm5, %v4408_v13, 0.0 }
 0x1fe   : > { %2085 = vst.msk [vmem:[%s4188_s12 + $0xe0] sm:$0xff] %vm931_vm5, %v4527_v5  ;;  %v4536_v63 = vpop.f32.mrb[62].mxu1  ;;  %v1797_v34 = vsel %vm931_vm5, %v1745_v21, 0.0  ;;  %v2129_v35 = vadd.f32 %v2128_v18, %v2127_v44  ;;  %v2178_v23 = vmul.f32 %v4408_v13, %v4408_v13  ;;  %v2228_v61 = vadd.f32 %v2227_v14, %v2226_v31 }
 0x1ff   : > { %2088 = vst.msk [vmem:[%s4188_s12 + $0xf8] sm:$0xff] %vm931_vm5, %v4536_v63  ;;  %v4544_v11 = vpop.f32.mrb[63].mxu1  ;;  %v1700_v19 = vsel %vm931_vm5, %v2874_v39, 0.0  ;;  %v1699_v9 = vadd.f32 %v1698_v29, %v1697_v24  ;;  %v1798_v48 = vadd.f32 %v1797_v34, %v1796_v56  ;;  %v2132_v1 = vsel %vm931_vm5, %v4396_v2, 0.0 }
 0x200   : > { %2086 = vst.msk [vmem:[%s4188_s12 + $0xe8] sm:$0xff] %vm931_vm5, %v4544_v11  ;;  %v2229_v6 = vsel %vm931_vm5, %v2178_v23, 0.0  ;;  %v2130_v13 = vsel %vm931_vm5, %v4424_v36, 0.0  ;;  %v2179_v33 = vmul.f32 %v4424_v36, %v4424_v36  ;;  %v2876_v51 = vadd.f32 %v4439_v59, %v4162_v46 }
 0x201   : > { %v1801_v43 = vsel %vm931_vm5, %v1747_v40, 0.0  ;;  %v1800_v25 = vadd.f32 %v1799_v53, %v1798_v48  ;;  %v2230_v62 = vadd.f32 %v2229_v6, %v2228_v61  ;;  %v2131_v2 = vadd.f32 %v2130_v13, %v2129_v35 }
 0x202   : > { %v2233_v26 = vsel %vm931_vm5, %v2180_v27, 0.0  ;;  %v2181_v38 = vmul.f32 %v4413_v30, %v4413_v30  ;;  %v2231_v37 = vsel %vm931_vm5, %v2179_v33, 0.0  ;;  %1649 = vst.msk [vmem:[%s4182_s11 + $0xd0] sm:$0xff] %vm931_vm5, %v2876_v51  ;;  %v2877_v36 = vadd.f32 %v4444_v15, %v4164_v50 }
 0x203   : > { %v2133_v22 = vadd.f32 %v2132_v1, %v2131_v2  ;;  %v2232_v46 = vadd.f32 %v2231_v37, %v2230_v62  ;;  %v1701_v59 = vadd.f32 %v1700_v19, %v1699_v9  ;;  %v1802_v16 = vadd.f32 %v1801_v43, %v1800_v25 }
 0x204   : > { %v1750_v39 = vmul.f32 %v2876_v51, %v2876_v51  ;;  %1647 = vst.msk [vmem:[%s4182_s11 + $0xc0] sm:$0xff] %vm931_vm5, %v2877_v36  ;;  %v1702_v54 = vsel %vm931_vm5, %v2877_v36, 0.0  ;;  %v1748_v31 = vmul.f32 %v2877_v36, %v2877_v36  ;;  %v2878_v41 = vadd.f32 %v4450_v12, %v4166_v4 }
 0x205   : > { %v2234_v3 = vadd.f32 %v2233_v26, %v2232_v46  ;;  %v1703_v14 = vadd.f32 %v1702_v54, %v1701_v59  ;;  %v2879_v50 = vadd.f32 %v4455_v28, %v4168_v10  ;;  %v2134_v15 = vsel %vm931_vm5, %v4413_v30, 0.0 }
 0x206   : > { %v2235_v29 = vsel %vm931_vm5, %v2181_v38, 0.0  ;;  %v1706_v53 = vsel %vm931_vm5, %v2876_v51, 0.0  ;;  %v1803_v52 = vsel %vm931_vm5, %v1748_v31, 0.0  ;;  %1650 = vst.msk [vmem:[%s4182_s11 + $0xd8] sm:$0xff] %vm931_vm5, %v2878_v41  ;;  %v2135_v20 = vadd.f32 %v2134_v15, %v2133_v22 }
 0x207   : > { %v1804_v56 = vadd.f32 %v1803_v52, %v1802_v16  ;;  %1648 = vst.msk [vmem:[%s4182_s11 + $0xc8] sm:$0xff] %vm931_vm5, %v2879_v50  ;;  %v1704_v4 = vsel %vm931_vm5, %v2879_v50, 0.0  ;;  %v1749_v12 = vmul.f32 %v2879_v50, %v2879_v50  ;;  %v1807_v10 = vsel %vm931_vm5, %v1750_v39, 0.0 }
 0x208   : > { %v1751_v28 = vmul.f32 %v2878_v41, %v2878_v41  ;;  %v1705_v21 = vadd.f32 %v1704_v4, %v1703_v14  ;;  %v2136_v30 = vsel %vm931_vm5, %v4465_v60, 0.0  ;;  %v2182_v24 = vmul.f32 %v4465_v60, %v4465_v60 }
 0x209   : > { %v1805_v44 = vsel %vm931_vm5, %v1749_v12, 0.0  ;;  %v2137_v40 = vadd.f32 %v2136_v30, %v2135_v20  ;;  %v2236_v27 = vadd.f32 %v2235_v29, %v2234_v3  ;;  %v2140_v35 = vsel %vm931_vm5, %v4457_v42, 0.0 }
 0x20a   : > { %v1707_v18 = vadd.f32 %v1706_v53, %v1705_v21  ;;  %v1806_v34 = vadd.f32 %v1805_v44, %v1804_v56  ;;  %v2184_v23 = vmul.f32 %v4457_v42, %v4457_v42  ;;  %v2237_v61 = vsel %vm931_vm5, %v2182_v24, 0.0 }
 0x20b   : > { %v2138_v19 = vsel %vm931_vm5, %v4483_v47, 0.0  ;;  %v2183_v9 = vmul.f32 %v4483_v47, %v4483_v47  ;;  %v2880_v60 = vadd.f32 %v4495_v0, %v4173_v57  ;;  %v1708_v48 = vsel %vm931_vm5, %v2878_v41, 0.0 }
 0x20c   : > { %v1808_v1 = vadd.f32 %v1807_v10, %v1806_v34  ;;  %v2238_v6 = vadd.f32 %v2237_v61, %v2236_v27  ;;  %v2139_v13 = vadd.f32 %v2138_v19, %v2137_v40  ;;  %v1809_v42 = vsel %vm931_vm5, %v1751_v28, 0.0 }
 0x20d   : > { %v2185_v33 = vmul.f32 %v4477_v7, %v4477_v7  ;;  %v2239_v51 = vsel %vm931_vm5, %v2183_v9, 0.0  ;;  %1653 = vst.msk [vmem:[%s4182_s11 + $0xf0] sm:$0xff] %vm931_vm5, %v2880_v60  ;;  %v2881_v57 = vadd.f32 %v4503_v8, %v4175_v17  ;;  %v1709_v43 = vadd.f32 %v1708_v48, %v1707_v18 }
 0x20e   : > { %v2141_v47 = vadd.f32 %v2140_v35, %v2139_v13  ;;  %v2240_v0 = vadd.f32 %v2239_v51, %v2238_v6  ;;  %v1810_v25 = vadd.f32 %v1809_v42, %v1808_v1  ;;  %v2241_v62 = vsel %vm931_vm5, %v2184_v23, 0.0 }
 0x20f   : > { %1651 = vst.msk [vmem:[%s4182_s11 + $0xe0] sm:$0xff] %vm931_vm5, %v2881_v57  ;;  %v1710_v2 = vsel %vm931_vm5, %v2881_v57, 0.0  ;;  %v1752_v26 = vmul.f32 %v2881_v57, %v2881_v57  ;;  %v2882_v38 = vadd.f32 %v4509_v58, %v4177_v49  ;;  %v2883_v37 = vadd.f32 %v4517_v55, %v4180_v45 }
 0x210   : > { %v2242_v17 = vadd.f32 %v2241_v62, %v2240_v0  ;;  %v1711_v8 = vadd.f32 %v1710_v2, %v1709_v43  ;;  %v2142_v36 = vsel %vm931_vm5, %v4477_v7, 0.0  ;;  %v2243_v49 = vsel %vm931_vm5, %v2185_v33, 0.0 }
 0x211   : > { %v1754_v58 = vmul.f32 %v2880_v60, %v2880_v60  ;;  %v1811_v22 = vsel %vm931_vm5, %v1752_v26, 0.0  ;;  %1654 = vst.msk [vmem:[%s4182_s11 + $0xf8] sm:$0xff] %vm931_vm5, %v2882_v38  ;;  %1652 = vst.msk [vmem:[%s4182_s11 + $0xe8] sm:$0xff] %vm931_vm5, %v2883_v37  ;;  %v1712_v45 = vsel %vm931_vm5, %v2883_v37, 0.0  ;;  %v1753_v55 = vmul.f32 %v2883_v37, %v2883_v37  ;;  %s3172_s11 = sshll.u32 %s3343_s8, 4  ;;  %s3173_s11 = int_to_ptr.vmem [resolvable:$false] %s3172_s11 }
 0x212   : > { %v1812_v46 = vadd.f32 %v1811_v22, %v1810_v25  ;;  %v2143_v59 = vadd.f32 %v2142_v36, %v2141_v47  ;;  %v1714_v16 = vsel %vm931_vm5, %v2880_v60, 0.0  ;;  %v1755_v7 = vmul.f32 %v2882_v38, %v2882_v38  ;;  %s3174_s15 = scalar_lea.vmem %s3173_s11, 8192  ;;  %p3175_p1 = scmp.lt.s32.totalorder %s4628_s14, %s3173_s11 }
 0x213   : > { %v1713_v39 = vadd.f32 %v1712_v45, %v1711_v8  ;;  %v2144_v54 = vsel %vm931_vm5, %v4527_v5, 0.0  ;;  %p3176_p2 = scmp.lt.s32.totalorder %s3174_s15, %s3168_s30 }
 0x215   : > { %p3177_p3 = por %p3176_p2, %p3175_p1 }
 0x217   : > { %p3178_p5 = pnand %p3177_p3, %p3171_p0 }
 0x219   : > { %3181 = shalt.err (!%p3178_p5)
}
 0x21a   : > { %s3182_s16 = scalar_lea.hbm %s4624_s20, 4096  ;;  %s3186_s8 = scalar_lea.hbm %s4828_s3, 8192 }
 0x21b   : > { %p3183_p6 = scmp.ne.s32.totalorder %s4624_s20, %s3182_s16  ;;  %p3187_p10 = scmp.lt.u32.totalorder %s4624_s20, %s4828_s3 }
 0x21c   : > { %p3188_p11 = scmp.lt.u32.totalorder %s3186_s8, %s3182_s16  ;;  %p3190_p13 = scmp.lt.u32.totalorder %s3182_s16, %s4624_s20 }
 0x21d   : > { %p3184_p7 = pnand %p3183_p6, %p3425_p4 }
 0x21e   : > { %p3189_p12 = por %p3188_p11, %p3187_p10 }
 0x21f   : > { %p3185_p9 = pneg %p3184_p7 }
 0x220   : > { %p3191_p0 = por %p3190_p13, %p3189_p12 }
 0x222   : > { %p3192_p1 = pnand %p3191_p0, %p3185_p9 }
 0x224   : > { %3195 = shalt.err (!%p3192_p1)
}
 0x225   : > { %s4847_s30 = smov 128   ;;  %v1813_v31 = vsel %vm931_vm5, %v1753_v55, 0.0  ;;  %v2145_v41 = vadd.f32 %v2144_v54, %v2143_v59  ;;  %v2186_v3 = vmul.f32 %v4527_v5, %v4527_v5  ;;  %v2244_v14 = vadd.f32 %v2243_v49, %v2242_v17  ;;  %s2543_s27 = sshll.u32 %s4171_s17, 1 }
 0x226   : > { %2920 = dma.vmem_to_hbm [thread:$0]  (%p3425_p4), %s4628_s14, 4096, %s4624_s20, %s2262_s19, %s4847_s30, %s4847_s30, %s4848_s18   ;;  %v1815_v50 = vsel %vm931_vm5, %v1754_v58, 0.0  ;;  %v1716_v15 = vsel %vm931_vm5, %v2882_v38, 0.0  ;;  %v1715_v29 = vadd.f32 %v1714_v16, %v1713_v39  ;;  %v1814_v53 = vadd.f32 %v1813_v31, %v1812_v46 }
 0x227   : > { %v2188_v52 = vmul.f32 %v4519_v32, %v4519_v32  ;;  %v2245_v56 = vsel %vm931_vm5, %v2186_v3, 0.0  ;;  %v2146_v4 = vsel %vm931_vm5, %v4544_v11, 0.0  ;;  %v2187_v12 = vmul.f32 %v4544_v11, %v4544_v11  ;;  %s4882_s28 = sadd.s32 4294967295, %s3338_s26   ;;  %s2630_s14 = sshll.u32 %s3330_s24, 5 }
 0x228   : > { %v1717_v20 = vadd.f32 %v1716_v15, %v1715_v29  ;;  %v1816_v5 = vadd.f32 %v1815_v50, %v1814_v53  ;;  %v2246_v10 = vadd.f32 %v2245_v56, %v2244_v14  ;;  %v1817_v28 = vsel %vm931_vm5, %v1755_v7, 0.0  ;;  %s4694_s13 = sand.u32 1, %s4882_s28   ;;  %s304_s20 = scalar_lea.vmem [#allocation4], %s2543_s27 }
 0x229   : > { %v2189_v21 = vmul.f32 %v4536_v63, %v4536_v63  ;;  %v2147_v30 = vadd.f32 %v2146_v4, %v2145_v41  ;;  %v2247_v44 = vsel %vm931_vm5, %v2187_v12, 0.0  ;;  %v2148_v27 = vsel %vm931_vm5, %v4519_v32, 0.0  ;;  %s2308_s19 = sshll.u32 %s304_s20, 4  ;;  %s2322_s15 = sshll.u32 %s4188_s12, 4  ;;  %s4706_s19 = int_to_ptr.vmem [resolvable:$true] %s2308_s19  ;;  %s4716_s15 = int_to_ptr.vmem [resolvable:$true] %s2322_s15 }
 0x22a   : > { %v1718_v40 = vrot.slane %v1717_v20, 4  ;;  %v1818_v24 = vadd.f32 %v1817_v28, %v1816_v5  ;;  %v2248_v18 = vadd.f32 %v2247_v44, %v2246_v10  ;;  %v2249_v11 = vsel %vm931_vm5, %v2188_v52, 0.0  ;;  %s4701_s11 = scalar_lea.hbm %s4829_s4, %s2630_s14  ;;  %s4703_s28 = scalar_lea.vmem [#allocation7], %s2543_s27 }
 0x22b   : > { %v2149_v34 = vadd.f32 %v2148_v27, %v2147_v30  ;;  %v2150_v61 = vsel %vm931_vm5, %v4536_v63, 0.0  ;;  %v2251_v9 = vsel %vm931_vm5, %v2189_v21, 0.0  ;;  %vm1826_vm7 = vcmask 123904   ;;  %s2339_s30 = sshll.u32 %s4703_s28, 4  ;;  %s4883_s18 = sshll.u32 %s3330_s24, 12  ;;  %s4724_s30 = int_to_ptr.vmem [resolvable:$true] %s2339_s30 }
 0x22c   : > { %v1719_v35 = vadd.f32 %v1718_v40, %v1717_v20  ;;  %v1819_v23 = vrot.slane %v1818_v24, 4  ;;  %v2250_v19 = vadd.f32 %v2249_v11, %v2248_v18  ;;  %s4713_s1 = scalar_lea.hbm %s4830_s5, %s4883_s18  ;;  %s4722_s24 = scalar_lea.hbm %s4831_s6, %s2630_s14 }
 0x22d   : > { %v2151_v60 = vadd.f32 %v2150_v61, %v2149_v34  ;;  %s2267_s0 = scalar_lea.sflag [#allocation5], %s4694_s13  ;;  %s3196_s8 = scalar_lea.vmem %s4706_s19, 32 }
 0x22e   : > { %v1720_v48 = vrot.slane %v1719_v35, 2  ;;  %v1820_v1 = vadd.f32 %v1819_v23, %v1818_v24  ;;  %v2252_v6 = vadd.f32 %v2251_v9, %v2250_v19  ;;  %p3197_p2 = scmp.ne.s32.totalorder %s4706_s19, %s3196_s8  ;;  %s3345_s18 = smov [#allocation4]  }
 0x22f   : > { %v2152_v32 = vrot.slane %v2151_v60, 4  ;;  %s3200_s12 = sshll.u32 %s3345_s18, 4  ;;  %s3201_s12 = int_to_ptr.vmem [resolvable:$false] %s3200_s12 }
 0x230   : > { %v2253_v13 = vrot.slane %v2252_v6, 4  ;;  %v1721_v42 = vadd.f32 %v1720_v48, %v1719_v35  ;;  %v1821_v33 = vrot.slane %v1820_v1, 2  ;;  %p3198_p3 = pnand %p3197_p2, %p3425_p4  ;;  %s3202_s2 = scalar_lea.vmem %s3201_s12, 64 }
 0x231   : > { %v2153_v51 = vadd.f32 %v2152_v32, %v2151_v60  ;;  %p3203_p6 = scmp.lt.s32.totalorder %s4706_s19, %s3201_s12  ;;  %p3204_p7 = scmp.lt.s32.totalorder %s3202_s2, %s3196_s8 }
 0x232   : > { %v2254_v57 = vadd.f32 %v2253_v13, %v2252_v6  ;;  %v1722_v47 = vrot.slane %v1721_v42, 1  ;;  %v1822_v0 = vadd.f32 %v1821_v33, %v1820_v1  ;;  %p3199_p5 = pneg %p3198_p3 }
 0x233   : > { %v2154_v63 = vrot.slane %v2153_v51, 2  ;;  %p3205_p9 = por %p3204_p7, %p3203_p6 }
 0x234   : > { %v2255_v43 = vrot.slane %v2254_v57, 2  ;;  %v1823_v25 = vrot.slane %v1822_v0, 1  ;;  %v1723_v2 = vadd.f32 %v1722_v47, %v1721_v42 }
 0x235   : > { %v2155_v62 = vadd.f32 %v2154_v63, %v2153_v51  ;;  %p3206_p10 = pnand %p3205_p9, %p3199_p5 }
 0x236   : > { %v1824_v26 = vadd.f32 %v1823_v25, %v1822_v0  ;;  %v2256_v38 = vadd.f32 %v2255_v43, %v2254_v57 }
 0x237   : > { %v2156_v17 = vrot.slane %v2155_v62, 1 }
 0x238   : > { %v1825_v8 = vsel %vm397_vm0, %v1723_v2, %v1824_v26  ;;  %v2257_v37 = vrot.slane %v2256_v38, 1 }
 0x239   : > { %1827 = vst.msk [vmem:[%s304_s20] sm:$0x3] %vm1826_vm7, %v1825_v8 }
 0x23a   : > { %3209 = shalt.err (!%p3206_p10)
}
 0x23b   : > { %s3210_s14 = scalar_lea.hbm %s4701_s11, 32  ;;  %s3214_s16 = scalar_lea.hbm %s4829_s4, 64 }
 0x23c   : > { %p3211_p11 = scmp.ne.s32.totalorder %s4701_s11, %s3210_s14  ;;  %p3215_p0 = scmp.lt.u32.totalorder %s4701_s11, %s4829_s4 }
 0x23d   : > { %p3216_p1 = scmp.lt.u32.totalorder %s3214_s16, %s3210_s14  ;;  %p3218_p3 = scmp.lt.u32.totalorder %s3210_s14, %s4701_s11 }
 0x23e   : > { %p3212_p12 = pnand %p3211_p11, %p3425_p4 }
 0x23f   : > { %p3217_p2 = por %p3216_p1, %p3215_p0 }
 0x240   : > { %p3213_p13 = pneg %p3212_p12 }
 0x241   : > { %p3219_p5 = por %p3218_p3, %p3217_p2 }
 0x243   : > { %p3220_p6 = pnand %p3219_p5, %p3213_p13 }
 0x245   : > { %3223 = shalt.err (!%p3220_p6)
}
 0x246   : > { %2921 = dma.vmem_to_hbm [thread:$0]  (%p3425_p4), %s4706_s19, 32, %s4701_s11, %s2267_s0   ;;  %v2157_v36 = vadd.f32 %v2156_v17, %v2155_v62  ;;  %v2258_v49 = vadd.f32 %v2257_v37, %v2256_v38 }
 0x247   : > { %s3224_s2 = scalar_lea.vmem %s4716_s15, 4096  ;;  %s3346_s8 = smov [#allocation6]  }
 0x248   : > { %p3225_p7 = scmp.ne.s32.totalorder %s4716_s15, %s3224_s2  ;;  %s3228_s14 = sshll.u32 %s3346_s8, 4  ;;  %s3229_s14 = int_to_ptr.vmem [resolvable:$false] %s3228_s14 }
 0x249   : > { %s3230_s20 = scalar_lea.vmem %s3229_s14, 8192  ;;  %p3231_p11 = scmp.lt.s32.totalorder %s4716_s15, %s3229_s14 }
 0x24a   : > { %p3226_p9 = pnand %p3225_p7, %p3425_p4  ;;  %p3232_p12 = scmp.lt.s32.totalorder %s3230_s20, %s3224_s2 }
 0x24c   : > { %p3227_p10 = pneg %p3226_p9  ;;  %p3233_p13 = por %p3232_p12, %p3231_p11 }
 0x24e   : > { %p3234_p0 = pnand %p3233_p13, %p3227_p10 }
 0x250   : > { %3237 = shalt.err (!%p3234_p0)
}
 0x251   : > { %s3238_s19 = scalar_lea.hbm %s4713_s1, 4096  ;;  %s3242_s16 = scalar_lea.hbm %s4830_s5, 8192 }
 0x252   : > { %p3239_p1 = scmp.ne.s32.totalorder %s4713_s1, %s3238_s19  ;;  %p3243_p5 = scmp.lt.u32.totalorder %s4713_s1, %s4830_s5 }
 0x253   : > { %p3244_p6 = scmp.lt.u32.totalorder %s3242_s16, %s3238_s19  ;;  %p3246_p9 = scmp.lt.u32.totalorder %s3238_s19, %s4713_s1 }
 0x254   : > { %p3240_p2 = pnand %p3239_p1, %p3425_p4 }
 0x255   : > { %p3245_p7 = por %p3244_p6, %p3243_p5 }
 0x256   : > { %p3241_p3 = pneg %p3240_p2 }
 0x257   : > { %p3247_p10 = por %p3246_p9, %p3245_p7 }
 0x259   : > { %p3248_p11 = pnand %p3247_p10, %p3241_p3 }
 0x25b   : > { %3251 = shalt.err (!%p3248_p11)
}
 0x25c   : > { %s4884_s2 = smov 8   ;;  %s4885_s8 = smov 128   ;;  %v2259_v58 = vsel %vm397_vm0, %v2157_v36, %v2258_v49 }
 0x25d   : > { %2922 = dma.vmem_to_hbm [thread:$0]  (%p3425_p4), %s4716_s15, 4096, %s4713_s1, %s2267_s0, %s4885_s8, %s4885_s8, %s4884_s2  }
 0x25e   : > { %2260 = vst.msk [vmem:[%s4703_s28] sm:$0x3] %vm1826_vm7, %v2259_v58  ;;  %s2277_s14 = scalar_lea.sflag [#allocation8], %s4171_s17  ;;  %s3252_s20 = scalar_lea.vmem %s4724_s30, 32 }
 0x25f   : > { %p3253_p12 = scmp.ne.s32.totalorder %s4724_s30, %s3252_s20  ;;  %s3347_s13 = smov [#allocation7]  }
 0x260   : > { %s3256_s19 = sshll.u32 %s3347_s13, 4  ;;  %s3257_s19 = int_to_ptr.vmem [resolvable:$false] %s3256_s19 }
 0x261   : > { %p3254_p13 = pnand %p3253_p12, %p3425_p4  ;;  %s3258_s11 = scalar_lea.vmem %s3257_s19, 64 }
 0x262   : > { %p3259_p1 = scmp.lt.s32.totalorder %s4724_s30, %s3257_s19  ;;  %p3260_p2 = scmp.lt.s32.totalorder %s3258_s11, %s3252_s20 }
 0x263   : > { %p3255_p0 = pneg %p3254_p13 }
 0x264   : > { %p3261_p3 = por %p3260_p2, %p3259_p1 }
 0x266   : > { %p3262_p5 = pnand %p3261_p3, %p3255_p0 }
 0x268   : > { %3265 = shalt.err (!%p3262_p5)
}
 0x269   : > { %s3266_s1 = scalar_lea.hbm %s4722_s24, 32  ;;  %s3270_s28 = scalar_lea.hbm %s4831_s6, 64 }
 0x26a   : > { %p3267_p6 = scmp.ne.s32.totalorder %s4722_s24, %s3266_s1  ;;  %p3271_p10 = scmp.lt.u32.totalorder %s4722_s24, %s4831_s6 }
 0x26b   : > { %p3272_p11 = scmp.lt.u32.totalorder %s3270_s28, %s3266_s1  ;;  %p3274_p13 = scmp.lt.u32.totalorder %s3266_s1, %s4722_s24 }
 0x26c   : > { %p3268_p7 = pnand %p3267_p6, %p3425_p4 }
 0x26d   : > { %p3273_p12 = por %p3272_p11, %p3271_p10 }
 0x26e   : > { %p3269_p9 = pneg %p3268_p7 }
 0x26f   : > { %p3275_p0 = por %p3274_p13, %p3273_p12 }
 0x271   : > { %p3276_p1 = pnand %p3275_p0, %p3269_p9 }
 0x273   : > { %3279 = shalt.err (!%p3276_p1)
}
 0x274   : > { %2923 = dma.vmem_to_hbm [thread:$0]  (%p3425_p4), %s4724_s30, 32, %s4722_s24, %s2277_s14  }
 0x275 PF: > { %p2941_p2 = scmp.ge.s32.totalorder %s3338_s26, 2  ;;  %s2351_s16 = sand.u32 1, %s3318_s21  }
 0x276   : > { %s2352_s18 = scalar_lea.sflag [#allocation3], %s2351_s16 }
 0x277   : > { %p2929_p3 = pnand %p2941_p2, %p3434_p8 }
 0x279   : > { %3305 = dma.done.wait (!%p2929_p3), %s2352_s18, 4096  }
 0x27a   : > { %3307 = vsyncadd (!%p2929_p3), %s2352_s18, 4294963200  ;;  %s4886_s12 = sadd.s32 4294967294, %s3338_s26  }
 0x27b   : > { %s2360_s2 = sand.u32 1, %s4886_s12  }
 0x27c   : > { %s2361_s8 = scalar_lea.sflag [#allocation5], %s2360_s2 }
 0x27d   : > { %3309 = dma.done.wait (!%p2929_p3), %s2361_s8, 4128  }
 0x27e   : > { %3311 = vsyncadd (!%p2929_p3), %s2361_s8, 4294963168  ;;  %s2379_s7 = scalar_lea.sflag [#allocation8], %s2351_s16 }
 0x27f   : > { %3313 = dma.done.wait (!%p2929_p3), %s2379_s7, 32  }
 0x280   : > { %3315 = vsyncadd (!%p2929_p3), %s2379_s7, 4294967264  ;;  %s26_s26 = sadd.s32 1, %s3338_s26   ;;  %s4887_s21 = smov %s3322_s22 }
 0x281   : > { %p23_p4 = scmp.ge.s32.totalorder %s26_s26, 4   ;;  %s4888_s22 = smov %s3326_s23 }
 0x282   : > { %s4889_s23 = smov %s3440_s10  ;;  %s4890_s24 = smov %s3334_s25 }
 0x283   : > { %s4891_s25 = smov %s4893_s29  ;;  %25 = sbr.rel (!%p23_p4) target bundleno = 12 (0xc), region = 124 }
 0x28a   :  { %2384 = vsyncpa [#allocation3], 1 }
 0x28b   :  { %2386 = vsyncpa [#allocation3 + $0x1], 1 }
 0x28c   :  { %2387 = vsyncpa [#allocation5], 1 }
 0x28d   :  { %2389 = vsyncpa [#allocation5 + $0x1], 1 }
 0x28e   :  { %2390 = vsyncpa [#allocation8], 1 }
 0x28f   :  { %2392 = vsyncpa [#allocation8 + $0x1], 1 }

</bundles_post_ra>
